<compile_context>
chip_gen: v7x
topology: tpu7x:2x2x1
jax: 0.10.0
libtpu: 0.0.40
codegen_flags: <defaults>
</compile_context>

<pallas_src>
import math

import jax
import jax.numpy as jnp
from jax.experimental import pallas as pl
from jax.experimental.pallas import tpu as pltpu

TWO_PI = 2.0 * math.pi


def _round_up(n: int, m: int) -> int:
    return ((n + m - 1) // m) * m


def _choose_pack_factor(fin: int, fout: int, max_w_bytes: int = 4 << 20) -> int:
    """Pick g so g*fout (and ideally g*fin) is a multiple of 128 lanes while the
    block-diagonal weight stays small. Falls back to g=1 for large features."""
    g_out = 128 // math.gcd(fout, 128)                      # g*fout % 128 == 0
    g_in = 128 // math.gcd(fin, 128)                        # g*fin  % 128 == 0
    g_both = (g_out * g_in) // math.gcd(g_out, g_in)        # lcm
    for g in (g_both, g_out):
        if (g * fin) * (g * fout) * 4 <= max_w_bytes:
            return g
    return 1


def _fourier_features_kernel(x_ref, w_ref, cos_ref, sin_ref):
    # x_ref: (TB, g*Fin)  w_ref: (g*Fin, g*Fout)  cos_ref/sin_ref: (TB, g*Fout)
    # w_ref already holds kron(I_g, 2*pi*W^T): one lane-dense MXU matmul, then
    # EUP cos/sin and unmasked lane-dense stores.
    f = jnp.dot(x_ref[...].astype(jnp.float32), w_ref[...],
                preferred_element_type=jnp.float32)
    # TODO(synk): if a bundle dump shows the VALU slot saturating on v7x, share
    # the sin/cos range reduction instead of two independent calls.
    cos_ref[...] = jnp.cos(f).astype(cos_ref.dtype)
    sin_ref[...] = jnp.sin(f).astype(sin_ref.dtype)


def fourier_features_forward(x, weight, *, packed_batch_tile=512):
    """x: [..., in_features], weight: [out_features, in_features].

    Returns (cos(f), sin(f)), f = 2*pi * x @ weight.T, each [..., out_features],
    matching FourierFeatures_aot.forward.
    """
    orig_shape = x.shape
    fin = orig_shape[-1]
    fout, w_fin = weight.shape
    assert w_fin == fin, "weight in_features must match input last dim"
    out_dtype = x.dtype

    # ---- lane-dense packing ------------------------------------------------
    g = _choose_pack_factor(fin, fout)
    wt = (jnp.float32(TWO_PI) * weight.astype(jnp.float32)).T        # (Fin, Fout)
    # Block-diagonal weight: a packed row [x_0|x_1|...|x_{g-1}] @ w_eff gives
    # [f_0|f_1|...|f_{g-1}] — i.e. the row-major reshape of the real output.
    w_eff = jnp.kron(jnp.eye(g, dtype=jnp.float32), wt) if g > 1 else wt

    # ---- flatten / pad / pack the batch -------------------------------------
    x2 = x.reshape(-1, fin)                       # row-major, free
    b = x2.shape[0]
    bp = pl.cdiv(b, g)                            # packed rows needed
    tb = min(packed_batch_tile, _round_up(bp, 8)) # multiple of 8 sublanes
    bp_pad = _round_up(bp, tb)                    # ragged tail -> zero padding
    b_pad = bp_pad * g
    if b_pad != b:
        x2 = jnp.pad(x2, ((0, b_pad - b), (0, 0)))
    xp = x2.reshape(bp_pad, g * fin)              # free reinterpretation

    grid = (bp_pad // tb,)

    cos_p, sin_p = pl.pallas_call(
        _fourier_features_kernel,
        out_shape=(
            jax.ShapeDtypeStruct((bp_pad, g * fout), out_dtype),
            jax.ShapeDtypeStruct((bp_pad, g * fout), out_dtype),
        ),
        grid_spec=pltpu.PrefetchScalarGridSpec(
            num_scalar_prefetch=0,
            grid=grid,
            in_specs=[
                pl.BlockSpec((tb, g * fin), lambda i: (i, 0)),
                # Weight: constant index_map -> stays VMEM-resident across steps.
                pl.BlockSpec((g * fin, g * fout), lambda i: (0, 0)),
            ],
            out_specs=[
                pl.BlockSpec((tb, g * fout), lambda i: (i, 0)),
                pl.BlockSpec((tb, g * fout), lambda i: (i, 0)),
            ],
        ),
        compiler_params=pltpu.CompilerParams(
            dimension_semantics=("parallel",),
        ),
    )(xp, w_eff)

    # Unpack (free row-major reshape), drop padding rows, restore leading dims.
    new_shape = orig_shape[:-1] + (fout,)
    cos_out = cos_p.reshape(b_pad, fout)[:b].reshape(new_shape)
    sin_out = sin_p.reshape(b_pad, fout)[:b].reshape(new_shape)
    return cos_out, sin_out


def _reference_forward(x, weight):
    """Pure-JAX reference with identical semantics to the PyTorch module."""
    f = TWO_PI * jnp.einsum("...i,oi->...o", x, weight)
    return jnp.cos(f), jnp.sin(f)


if __name__ == "__main__":
    key = jax.random.PRNGKey(0)
    k_x, k_w = jax.random.split(key, 2)

    # FourierFeatures(in_features=4, out_features=32) on a small (2, 16, 4) batch.
    BATCH, SEQ, IN_FEATURES, OUT_FEATURES, STD = 2, 16, 4, 32, 1.0
    x = jax.random.normal(k_x, (BATCH, SEQ, IN_FEATURES), dtype=jnp.float32)
    weight = STD * jax.random.normal(
        k_w, (OUT_FEATURES, IN_FEATURES), dtype=jnp.float32)

    cos_out, sin_out = fourier_features_forward(x, weight)
    cos_out = jax.block_until_ready(cos_out)
    sin_out = jax.block_until_ready(sin_out)

    cos_ref, sin_ref = _reference_forward(x, weight)

    assert cos_out.shape == (BATCH, SEQ, OUT_FEATURES)
    assert sin_out.shape == (BATCH, SEQ, OUT_FEATURES)
    assert jnp.allclose(cos_out, cos_ref, rtol=1e-4, atol=1e-4), "cos mismatch"
    assert jnp.allclose(sin_out, sin_ref, rtol=1e-4, atol=1e-4), "sin mismatch"

    print("KERNEL_OK")
</pallas_src>

<mosaic_0001>
module attributes {stable_mosaic.version = 11 : i64} {
  func.func @_fourier_features_kernel(%arg0: i32, %arg1: memref<8x128xf32, #tpu.memory_space<vmem>>, %arg2: memref<128x1024xf32, #tpu.memory_space<vmem>>, %arg3: memref<8x1024xf32, #tpu.memory_space<vmem>>, %arg4: memref<8x1024xf32, #tpu.memory_space<vmem>>) attributes {dimension_semantics = [#tpu.dimension_semantics<parallel>], iteration_bounds = array<i64: 1>, scalar_prefetch = 0 : i64, scratch_operands = 0 : i64, tpu.core_type = #tpu.core_type<tc>, window_params = [{transform_indices = @transform_0, window_bounds = array<i64: 8, 128>}, {pipeline_mode = #tpu.pipeline_mode<synchronous>, transform_indices = @transform_1, window_bounds = array<i64: 128, 1024>}, {transform_indices = @transform_2, window_bounds = array<i64: 8, 1024>}, {transform_indices = @transform_3, window_bounds = array<i64: 8, 1024>}]} {
    %c0 = arith.constant 0 : index
    %c0_0 = arith.constant 0 : index
    %0 = vector.load %arg1[%c0, %c0_0] : memref<8x128xf32, #tpu.memory_space<vmem>>, vector<8x128xf32>
    %c0_1 = arith.constant 0 : index
    %c0_2 = arith.constant 0 : index
    %1 = vector.load %arg2[%c0_1, %c0_2] : memref<128x1024xf32, #tpu.memory_space<vmem>>, vector<128x1024xf32>
    %cst = arith.constant dense<0.000000e+00> : vector<8x1024xf32>
    %2 = tpu.matmul %0, %1, %cst {dimension_numbers = #tpu.dot_dimension_numbers<[1], [0], [0], [1], [0, 0, 1, 1], [], []>} : vector<8x128xf32>, vector<128x1024xf32>, vector<8x1024xf32> -> vector<8x1024xf32>
    %3 = math.cos %2 : vector<8x1024xf32>
    %c0_3 = arith.constant 0 : index
    %c0_4 = arith.constant 0 : index
    %4 = vector.load %arg3[%c0_3, %c0_4] : memref<8x1024xf32, #tpu.memory_space<vmem>>, vector<8x1024xf32>
    tpu.vector_store %arg3[%c0_3, %c0_4], %3 {strides = array<i32>} : memref<8x1024xf32, #tpu.memory_space<vmem>>, vector<8x1024xf32>,
    %5 = math.sin %2 : vector<8x1024xf32>
    %c0_5 = arith.constant 0 : index
    %c0_6 = arith.constant 0 : index
    %6 = vector.load %arg4[%c0_5, %c0_6] : memref<8x1024xf32, #tpu.memory_space<vmem>>, vector<8x1024xf32>
    tpu.vector_store %arg4[%c0_5, %c0_6], %5 {strides = array<i32>} : memref<8x1024xf32, #tpu.memory_space<vmem>>, vector<8x1024xf32>,
    return
  }
  func.func @transform_0(%arg0: i32) -> (i32, i32) {
    %c0_i32 = arith.constant 0 : i32
    %c0_i32_0 = arith.constant 0 : i32
    return %arg0, %c0_i32 : i32, i32
  }
  func.func @transform_1(%arg0: i32) -> (i32, i32) {
    %c0_i32 = arith.constant 0 : i32
    %c0_i32_0 = arith.constant 0 : i32
    %c0_i32_1 = arith.constant 0 : i32
    return %c0_i32, %c0_i32_0 : i32, i32
  }
  func.func @transform_2(%arg0: i32) -> (i32, i32) {
    %c0_i32 = arith.constant 0 : i32
    %c0_i32_0 = arith.constant 0 : i32
    return %arg0, %c0_i32 : i32, i32
  }
  func.func @transform_3(%arg0: i32) -> (i32, i32) {
    %c0_i32 = arith.constant 0 : i32
    %c0_i32_0 = arith.constant 0 : i32
    return %arg0, %c0_i32 : i32, i32
  }
}

</mosaic_0001>

<bundles_post_ra>
// kernel: tpu_custom_call.1
= control target key start
LH: loop header
LB: loop body
LE: loop exit
PB: predicated region body
PF: predicated region fallthrough
CT: control target
= control target key end

     0   :  { %9 = vsyncpa [#allocation3], 0  ;;  %s3356_s0 = inlined_call_operand.hbm [shape: f32[8,128], index: 0, kind: input, shape index: {}]   ;;  %s3357_s1 = inlined_call_operand.hbm [shape: f32[128,1024], index: 1, kind: input, shape index: {}]   ;;  %s3358_s2 = inlined_call_operand.hbm [shape: f32[8,1024], index: 2, kind: output, shape index: {0}]   ;;  %s3359_s3 = inlined_call_operand.hbm [shape: f32[8,1024], index: 3, kind: output, shape index: {1}]  }
   0x1   :  { %10 = vsyncpa [#allocation6], 0 }
   0x2   :  { %11 = vsyncpa [#allocation4], 0 }
   0x3   :  { %12 = vsyncpa [#allocation9], 0  ;;  %s2521_s12 = smov [#allocation2]   ;;  %s2522_s14 = smov [#allocation5]  }
   0x4   :  { %s19_s13 = sshll.u32 %s2521_s12, 4  ;;  %s28_s15 = sshll.u32 %s2522_s14, 4  ;;  %s20_s13 = int_to_ptr.vmem [resolvable:$true] %s19_s13  ;;  %s2554_s15 = int_to_ptr.vmem [resolvable:$true] %s28_s15 }
   0x5   :  { %s2425_s18 = scalar_lea.hbm %s3356_s0, 128 }
   0x6   :  { %p2426_p0 = scmp.ne.s32.totalorder %s3356_s0, %s2425_s18  ;;  %p2429_p1 = scmp.lt.u32.totalorder %s2425_s18, %s3356_s0 }
   0x8   :  { %p2431_p2 = pnand %p2429_p1, %p2426_p0 }
   0xa   :  { %2434 = shalt.err (!%p2431_p2)
}
   0xb   :  { %s2435_s23 = scalar_lea.vmem %s20_s13, 128  ;;  %p2440_p4 = scmp.lt.s32.totalorder %s20_s13, %s20_s13 }
   0xc   :  { %p2436_p3 = scmp.ne.s32.totalorder %s20_s13, %s2435_s23  ;;  %p2441_p5 = scmp.lt.s32.totalorder %s2435_s23, %s2435_s23 }
   0xe   :  { %p2442_p6 = por %p2441_p5, %p2440_p4 }
  0x10   :  { %p2443_p7 = pnand %p2442_p6, %p2436_p3 }
  0x12   :  { %2446 = shalt.err (!%p2443_p7)
}
  0x13   :  { %22 = dma.hbm_to_vmem [thread:$0]  %s3356_s0, 128, %s20_s13, [#allocation3]  }
  0x14   :  { %s2447_s28 = scalar_lea.hbm %s3357_s1, 16384 }
  0x15   :  { %p2448_p8 = scmp.ne.s32.totalorder %s3357_s1, %s2447_s28  ;;  %p2451_p9 = scmp.lt.u32.totalorder %s2447_s28, %s3357_s1 }
  0x17   :  { %p2453_p10 = pnand %p2451_p9, %p2448_p8 }
  0x19   :  { %2456 = shalt.err (!%p2453_p10)
}
  0x1a   :  { %s2457_s6 = scalar_lea.vmem %s2554_s15, 16384  ;;  %p2462_p12 = scmp.lt.s32.totalorder %s2554_s15, %s2554_s15 }
  0x1b   :  { %p2458_p11 = scmp.ne.s32.totalorder %s2554_s15, %s2457_s6  ;;  %p2463_p13 = scmp.lt.s32.totalorder %s2457_s6, %s2457_s6 }
  0x1d   :  { %p2464_p0 = por %p2463_p13, %p2462_p12 }
  0x1f   :  { %p2465_p1 = pnand %p2464_p0, %p2458_p11 }
  0x21   :  { %2468 = shalt.err (!%p2465_p1)
}
  0x22   :  { %s2523_s0 = smov 1024   ;;  %s2524_s7 = smov 64  }
  0x23   :  { %34 = dma.hbm_to_vmem [thread:$0]  %s3357_s1, 16384, %s2554_s15, [#allocation6], %s2523_s0, %s2523_s0, %s2524_s7  }
  0x24   :  { %2513 = dma.done.wait [#allocation3], 128  }
  0x25   :  { %2514 = vsyncadd [#allocation3], 4294967168 }
  0x26   :  { %2515 = dma.done.wait [#allocation6], 16384  }
  0x27   :  { %2516 = vsyncadd [#allocation6], 4294950912  ;;  %v2525_v0 = vmov 0.0   ;;  %v43_v1 = vld [vmem:[#allocation5 + $0x8] sm:$0xff]  ;;  %v45_v3 = vld [vmem:[#allocation5 + $0x18] sm:$0xff]  ;;  %s2532_s1 = smov [#allocation7]  }
  0x28   :  { %234 = vmatprep.mubr.f32.mxu0 %v2525_v0  ;;  %305 = vmatprep.mubr.f32.mxu1 %v2525_v0  ;;  %v51_v2 = vld [vmem:[#allocation5 + $0x48] sm:$0xff]  ;;  %v53_v5 = vld [vmem:[#allocation5 + $0x58] sm:$0xff]  ;;  %v42_v6 = vld [vmem:[#allocation5] sm:$0xff]  ;;  %s2132_s10 = sshll.u32 %s2532_s1, 4  ;;  %s2533_s11 = smov [#allocation8]   ;;  %s2133_s10 = int_to_ptr.vmem [resolvable:$true] %s2132_s10 }
  0x29   :  { %v2220_v4 = vpack.c.bf16 %v51_v2, %v43_v1  ;;  %v50_v7 = vld [vmem:[#allocation5 + $0x40] sm:$0xff]  ;;  %v2252_v8 = vpack.c.bf16 %v53_v5, %v45_v3  ;;  %v44_v10 = vld [vmem:[#allocation5 + $0x10] sm:$0xff]  ;;  %v59_v12 = vld [vmem:[#allocation5 + $0x88] sm:$0xff]  ;;  %s2142_s12 = sshll.u32 %s2533_s11, 4  ;;  %s2469_s13 = scalar_lea.vmem %s2133_s10, 1024  ;;  %s2143_s12 = int_to_ptr.vmem [resolvable:$true] %s2142_s12 }
  0x2a   :  { %v2222_v9 = vpack.c.bf16 %v50_v7, %v42_v6  ;;  %v52_v11 = vld [vmem:[#allocation5 + $0x50] sm:$0xff]  ;;  %v67_v14 = vld [vmem:[#allocation5 + $0xc8] sm:$0xff]  ;;  %v61_v15 = vld [vmem:[#allocation5 + $0x98] sm:$0xff]  ;;  %p2470_p2 = scmp.ne.s32.totalorder %s2133_s10, %s2469_s13  ;;  %p2474_p3 = scmp.lt.s32.totalorder %s2133_s10, %s2133_s10 }
  0x2b   :  { %2221 = vmatprep.subr.bf16.mxu0 %v2220_v4  ;;  %v2254_v13 = vpack.c.bf16 %v52_v11, %v44_v10  ;;  %v69_v16 = vld [vmem:[#allocation5 + $0xd8] sm:$0xff]  ;;  %2253 = vmatprep.subr.bf16.mxu1 %v2252_v8  ;;  %v2224_v17 = vpack.c.bf16 %v67_v14, %v59_v12  ;;  %v58_v19 = vld [vmem:[#allocation5 + $0x80] sm:$0xff]  ;;  %v60_v21 = vld [vmem:[#allocation5 + $0x90] sm:$0xff]  ;;  %p2475_p4 = scmp.lt.s32.totalorder %s2469_s13, %s2469_s13 }
  0x2c   :  { %2223 = vmatpush1.bf16.msra.mxu0 %v2222_v9  ;;  %v2256_v18 = vpack.c.bf16 %v69_v16, %v61_v15  ;;  %v66_v20 = vld [vmem:[#allocation5 + $0xc0] sm:$0xff]  ;;  %v68_v23 = vld [vmem:[#allocation5 + $0xd0] sm:$0xff]  ;;  %v75_v24 = vld [vmem:[#allocation5 + $0x108] sm:$0xff] }
  0x2d   :  { %2255 = vmatpush1.bf16.msra.mxu1 %v2254_v13  ;;  %v2226_v22 = vpack.c.bf16 %v66_v20, %v58_v19  ;;  %v83_v25 = vld [vmem:[#allocation5 + $0x148] sm:$0xff]  ;;  %2225 = vmatprep.subr.bf16.mxu0 %v2224_v17  ;;  %v2258_v26 = vpack.c.bf16 %v68_v23, %v60_v21  ;;  %v77_v28 = vld [vmem:[#allocation5 + $0x118] sm:$0xff]  ;;  %v74_v30 = vld [vmem:[#allocation5 + $0x100] sm:$0xff]  ;;  %p2476_p5 = por %p2475_p4, %p2474_p3 }
  0x2e   :  { %2257 = vmatprep.subr.bf16.mxu1 %v2256_v18  ;;  %v2228_v27 = vpack.c.bf16 %v83_v25, %v75_v24  ;;  %v85_v29 = vld [vmem:[#allocation5 + $0x158] sm:$0xff]  ;;  %v82_v32 = vld [vmem:[#allocation5 + $0x140] sm:$0xff]  ;;  %v76_v33 = vld [vmem:[#allocation5 + $0x110] sm:$0xff] }
  0x2f   :  { %v2260_v31 = vpack.c.bf16 %v85_v29, %v77_v28  ;;  %v84_v34 = vld [vmem:[#allocation5 + $0x150] sm:$0xff]  ;;  %v2230_v35 = vpack.c.bf16 %v82_v32, %v74_v30  ;;  %v91_v36 = vld [vmem:[#allocation5 + $0x188] sm:$0xff]  ;;  %v93_v38 = vld [vmem:[#allocation5 + $0x198] sm:$0xff]  ;;  %p2477_p6 = pnand %p2476_p5, %p2470_p2 }
  0x30   :  { %2227 = vmatpush1.bf16.msra.mxu0 %v2226_v22  ;;  %v99_v37 = vld [vmem:[#allocation5 + $0x1c8] sm:$0xff]  ;;  %v2262_v39 = vpack.c.bf16 %v84_v34, %v76_v33  ;;  %v101_v41 = vld [vmem:[#allocation5 + $0x1d8] sm:$0xff]  ;;  %v90_v42 = vld [vmem:[#allocation5 + $0x180] sm:$0xff] }
  0x31   :  { %2259 = vmatpush1.bf16.msra.mxu1 %v2258_v26  ;;  %2229 = vmatprep.subr.bf16.mxu0 %v2228_v27  ;;  %v2232_v40 = vpack.c.bf16 %v99_v37, %v91_v36  ;;  %v98_v43 = vld [vmem:[#allocation5 + $0x1c0] sm:$0xff]  ;;  %v2264_v44 = vpack.c.bf16 %v101_v41, %v93_v38  ;;  %v92_v45 = vld [vmem:[#allocation5 + $0x190] sm:$0xff]  ;;  %v107_v47 = vld [vmem:[#allocation5 + $0x208] sm:$0xff] }
  0x32   :  { %2261 = vmatprep.subr.bf16.mxu1 %v2260_v31  ;;  %v100_v46 = vld [vmem:[#allocation5 + $0x1d0] sm:$0xff]  ;;  %v115_v48 = vld [vmem:[#allocation5 + $0x248] sm:$0xff]  ;;  %v109_v49 = vld [vmem:[#allocation5 + $0x218] sm:$0xff]  ;;  %v2234_v51 = vpack.c.bf16 %v98_v43, %v90_v42 }
  0x33   :  { %v117_v50 = vld [vmem:[#allocation5 + $0x258] sm:$0xff]  ;;  %v2266_v52 = vpack.c.bf16 %v100_v46, %v92_v45  ;;  %v2236_v53 = vpack.c.bf16 %v115_v48, %v107_v47  ;;  %v106_v54 = vld [vmem:[#allocation5 + $0x200] sm:$0xff]  ;;  %v108_v56 = vld [vmem:[#allocation5 + $0x210] sm:$0xff] }
  0x34   :  { %2231 = vmatpush1.bf16.msra.mxu0 %v2230_v35  ;;  %v114_v55 = vld [vmem:[#allocation5 + $0x240] sm:$0xff]  ;;  %v2268_v57 = vpack.c.bf16 %v117_v50, %v109_v49  ;;  %v116_v58 = vld [vmem:[#allocation5 + $0x250] sm:$0xff]  ;;  %v123_v59 = vld [vmem:[#allocation5 + $0x288] sm:$0xff] }
  0x35   :  { %2263 = vmatpush1.bf16.msra.mxu1 %v2262_v39  ;;  %2233 = vmatprep.subr.bf16.mxu0 %v2232_v40  ;;  %v131_v60 = vld [vmem:[#allocation5 + $0x2c8] sm:$0xff]  ;;  %v125_v61 = vld [vmem:[#allocation5 + $0x298] sm:$0xff]  ;;  %v2238_v63 = vpack.c.bf16 %v114_v55, %v106_v54  ;;  %v2270_v1 = vpack.c.bf16 %v116_v58, %v108_v56  ;;  %v122_v3 = vld [vmem:[#allocation5 + $0x280] sm:$0xff] }
  0x36   :  { %2265 = vmatprep.subr.bf16.mxu1 %v2264_v44  ;;  %v133_v62 = vld [vmem:[#allocation5 + $0x2d8] sm:$0xff]  ;;  %v2240_v2 = vpack.c.bf16 %v131_v60, %v123_v59  ;;  %v130_v4 = vld [vmem:[#allocation5 + $0x2c0] sm:$0xff]  ;;  %v124_v5 = vld [vmem:[#allocation5 + $0x290] sm:$0xff] }
  0x37   :  { %v2272_v6 = vpack.c.bf16 %v133_v62, %v125_v61  ;;  %v132_v7 = vld [vmem:[#allocation5 + $0x2d0] sm:$0xff]  ;;  %v139_v8 = vld [vmem:[#allocation5 + $0x308] sm:$0xff]  ;;  %v141_v10 = vld [vmem:[#allocation5 + $0x318] sm:$0xff]  ;;  %v2242_v12 = vpack.c.bf16 %v130_v4, %v122_v3 }
  0x38   :  { %2235 = vmatpush1.bf16.msra.mxu0 %v2234_v51  ;;  %v147_v9 = vld [vmem:[#allocation5 + $0x348] sm:$0xff]  ;;  %v149_v11 = vld [vmem:[#allocation5 + $0x358] sm:$0xff]  ;;  %v2274_v13 = vpack.c.bf16 %v132_v7, %v124_v5  ;;  %v138_v15 = vld [vmem:[#allocation5 + $0x300] sm:$0xff] }
  0x39   :  { %2267 = vmatpush1.bf16.msra.mxu1 %v2266_v52  ;;  %2237 = vmatprep.subr.bf16.mxu0 %v2236_v53  ;;  %v2244_v14 = vpack.c.bf16 %v147_v9, %v139_v8  ;;  %v146_v16 = vld [vmem:[#allocation5 + $0x340] sm:$0xff]  ;;  %v140_v17 = vld [vmem:[#allocation5 + $0x310] sm:$0xff]  ;;  %v2276_v18 = vpack.c.bf16 %v149_v11, %v141_v10  ;;  %v155_v20 = vld [vmem:[#allocation5 + $0x388] sm:$0xff] }
  0x3a   :  { %2269 = vmatprep.subr.bf16.mxu1 %v2268_v57  ;;  %v148_v19 = vld [vmem:[#allocation5 + $0x350] sm:$0xff]  ;;  %v163_v21 = vld [vmem:[#allocation5 + $0x3c8] sm:$0xff]  ;;  %v157_v22 = vld [vmem:[#allocation5 + $0x398] sm:$0xff]  ;;  %v2246_v24 = vpack.c.bf16 %v146_v16, %v138_v15 }
  0x3b   :  { %v165_v23 = vld [vmem:[#allocation5 + $0x3d8] sm:$0xff]  ;;  %v2278_v25 = vpack.c.bf16 %v148_v19, %v140_v17  ;;  %v2248_v26 = vpack.c.bf16 %v163_v21, %v155_v20  ;;  %v154_v27 = vld [vmem:[#allocation5 + $0x380] sm:$0xff]  ;;  %v156_v29 = vld [vmem:[#allocation5 + $0x390] sm:$0xff] }
  0x3c   :  { %2239 = vmatpush1.bf16.msra.mxu0 %v2238_v63  ;;  %v162_v28 = vld [vmem:[#allocation5 + $0x3c0] sm:$0xff]  ;;  %v2280_v30 = vpack.c.bf16 %v165_v23, %v157_v22  ;;  %v164_v31 = vld [vmem:[#allocation5 + $0x3d0] sm:$0xff]  ;;  %v47_v32 = vld [vmem:[#allocation5 + $0x28] sm:$0xff] }
  0x3d   :  { %2271 = vmatpush1.bf16.msra.mxu1 %v2270_v1  ;;  %2241 = vmatprep.subr.bf16.mxu0 %v2240_v2  ;;  %v55_v33 = vld [vmem:[#allocation5 + $0x68] sm:$0xff]  ;;  %v49_v34 = vld [vmem:[#allocation5 + $0x38] sm:$0xff]  ;;  %v2250_v36 = vpack.c.bf16 %v162_v28, %v154_v27  ;;  %v2282_v37 = vpack.c.bf16 %v164_v31, %v156_v29  ;;  %v46_v39 = vld [vmem:[#allocation5 + $0x20] sm:$0xff] }
  0x3e   :  { %2273 = vmatprep.subr.bf16.mxu1 %v2272_v6  ;;  %v57_v35 = vld [vmem:[#allocation5 + $0x78] sm:$0xff]  ;;  %v2284_v38 = vpack.c.bf16 %v55_v33, %v47_v32  ;;  %v54_v40 = vld [vmem:[#allocation5 + $0x60] sm:$0xff]  ;;  %v48_v41 = vld [vmem:[#allocation5 + $0x30] sm:$0xff] }
  0x3f   :  { %v2316_v42 = vpack.c.bf16 %v57_v35, %v49_v34  ;;  %v56_v43 = vld [vmem:[#allocation5 + $0x70] sm:$0xff]  ;;  %v63_v44 = vld [vmem:[#allocation5 + $0xa8] sm:$0xff]  ;;  %v65_v46 = vld [vmem:[#allocation5 + $0xb8] sm:$0xff]  ;;  %v2286_v49 = vpack.c.bf16 %v54_v40, %v46_v39 }
  0x40   :  { %2243 = vmatpush1.bf16.msra.mxu0 %v2242_v12  ;;  %v71_v45 = vld [vmem:[#allocation5 + $0xe8] sm:$0xff]  ;;  %v73_v47 = vld [vmem:[#allocation5 + $0xf8] sm:$0xff]  ;;  %v2318_v50 = vpack.c.bf16 %v56_v43, %v48_v41  ;;  %v62_v52 = vld [vmem:[#allocation5 + $0xa0] sm:$0xff] }
  0x41   :  { %2275 = vmatpush1.bf16.msra.mxu1 %v2274_v13  ;;  %2245 = vmatprep.subr.bf16.mxu0 %v2244_v14  ;;  %v2587_v48 = vld [vmem:[#allocation2] sm:$0xff]  ;;  %v2288_v51 = vpack.c.bf16 %v71_v45, %v63_v44  ;;  %v70_v53 = vld [vmem:[#allocation5 + $0xe0] sm:$0xff]  ;;  %v64_v54 = vld [vmem:[#allocation5 + $0xb0] sm:$0xff]  ;;  %v2320_v55 = vpack.c.bf16 %v73_v47, %v65_v46 }
  0x42   :  { %2277 = vmatprep.subr.bf16.mxu1 %v2276_v18  ;;  %v72_v56 = vld [vmem:[#allocation5 + $0xf0] sm:$0xff]  ;;  %v79_v57 = vld [vmem:[#allocation5 + $0x128] sm:$0xff]  ;;  %v81_v59 = vld [vmem:[#allocation5 + $0x138] sm:$0xff]  ;;  %v2290_v61 = vpack.c.bf16 %v70_v53, %v62_v52 }
  0x43   :  { %v87_v58 = vld [vmem:[#allocation5 + $0x168] sm:$0xff]  ;;  %v89_v60 = vld [vmem:[#allocation5 + $0x178] sm:$0xff]  ;;  %v2322_v62 = vpack.c.bf16 %v72_v56, %v64_v54  ;;  %v78_v1 = vld [vmem:[#allocation5 + $0x120] sm:$0xff] }
  0x44   :  { %2247 = vmatpush1.bf16.msra.mxu0 %v2246_v24  ;;  %v2292_v63 = vpack.c.bf16 %v87_v58, %v79_v57  ;;  %v86_v2 = vld [vmem:[#allocation5 + $0x160] sm:$0xff]  ;;  %v80_v3 = vld [vmem:[#allocation5 + $0x130] sm:$0xff]  ;;  %v2324_v4 = vpack.c.bf16 %v89_v60, %v81_v59  ;;  %v95_v6 = vld [vmem:[#allocation5 + $0x1a8] sm:$0xff] }
  0x45   :  { %2279 = vmatpush1.bf16.msra.mxu1 %v2278_v25  ;;  %2249 = vmatprep.subr.bf16.mxu0 %v2248_v26  ;;  %v88_v5 = vld [vmem:[#allocation5 + $0x170] sm:$0xff]  ;;  %v103_v7 = vld [vmem:[#allocation5 + $0x1e8] sm:$0xff]  ;;  %v97_v8 = vld [vmem:[#allocation5 + $0x1b8] sm:$0xff]  ;;  %v2294_v10 = vpack.c.bf16 %v86_v2, %v78_v1 }
  0x46   :  { %2281 = vmatprep.subr.bf16.mxu1 %v2280_v30  ;;  %v105_v9 = vld [vmem:[#allocation5 + $0x1f8] sm:$0xff]  ;;  %v2326_v11 = vpack.c.bf16 %v88_v5, %v80_v3  ;;  %v2296_v12 = vpack.c.bf16 %v103_v7, %v95_v6  ;;  %v94_v13 = vld [vmem:[#allocation5 + $0x1a0] sm:$0xff]  ;;  %v96_v15 = vld [vmem:[#allocation5 + $0x1b0] sm:$0xff] }
  0x47   :  { %v102_v14 = vld [vmem:[#allocation5 + $0x1e0] sm:$0xff]  ;;  %v2328_v16 = vpack.c.bf16 %v105_v9, %v97_v8  ;;  %v104_v17 = vld [vmem:[#allocation5 + $0x1f0] sm:$0xff]  ;;  %v111_v18 = vld [vmem:[#allocation5 + $0x228] sm:$0xff] }
  0x48   :  { %2251 = vmatpush1.bf16.msra.mxu0 %v2250_v36  ;;  %v119_v19 = vld [vmem:[#allocation5 + $0x268] sm:$0xff]  ;;  %v113_v20 = vld [vmem:[#allocation5 + $0x238] sm:$0xff]  ;;  %v2298_v22 = vpack.c.bf16 %v102_v14, %v94_v13  ;;  %v110_v24 = vld [vmem:[#allocation5 + $0x220] sm:$0xff] }
  0x49   :  { %2283 = vmatpush1.bf16.msra.mxu1 %v2282_v37  ;;  %2285 = vmatprep.subr.bf16.mxu0 %v2284_v38  ;;  %v121_v21 = vld [vmem:[#allocation5 + $0x278] sm:$0xff]  ;;  %v2300_v23 = vpack.c.bf16 %v119_v19, %v111_v18  ;;  %v118_v25 = vld [vmem:[#allocation5 + $0x260] sm:$0xff]  ;;  %v112_v26 = vld [vmem:[#allocation5 + $0x230] sm:$0xff] }
  0x4a   :  { %2317 = vmatprep.subr.bf16.mxu1 %v2316_v42  ;;  %v2332_v27 = vpack.c.bf16 %v121_v21, %v113_v20  ;;  %v120_v28 = vld [vmem:[#allocation5 + $0x270] sm:$0xff]  ;;  %v127_v29 = vld [vmem:[#allocation5 + $0x2a8] sm:$0xff]  ;;  %v129_v31 = vld [vmem:[#allocation5 + $0x2b8] sm:$0xff]  ;;  %v2302_v33 = vpack.c.bf16 %v118_v25, %v110_v24 }
  0x4b   :  { %235 = vmatmul.mubr.f32.vlgmr.msra.gmra.mrb[0].mxu0 %v2587_v48  ;;  %v135_v30 = vld [vmem:[#allocation5 + $0x2e8] sm:$0xff]  ;;  %v137_v32 = vld [vmem:[#allocation5 + $0x2f8] sm:$0xff]  ;;  %v2334_v34 = vpack.c.bf16 %v120_v28, %v112_v26  ;;  %v126_v36 = vld [vmem:[#allocation5 + $0x2a0] sm:$0xff] }
  0x4c   :  { %306 = vmatmul.mubr.f32.vlgmr.msra.gmra.mrb[0].mxu1 %v2587_v48  ;;  %2287 = vmatpush1.bf16.msra.mxu0 %v2286_v49  ;;  %v2304_v35 = vpack.c.bf16 %v135_v30, %v127_v29  ;;  %v134_v37 = vld [vmem:[#allocation5 + $0x2e0] sm:$0xff]  ;;  %v128_v38 = vld [vmem:[#allocation5 + $0x2b0] sm:$0xff]  ;;  %v2336_v39 = vpack.c.bf16 %v137_v32, %v129_v31  ;;  %v143_v41 = vld [vmem:[#allocation5 + $0x328] sm:$0xff] }
  0x4d   :  { %2319 = vmatpush1.bf16.msra.mxu1 %v2318_v50  ;;  %2289 = vmatprep.subr.bf16.mxu0 %v2288_v51  ;;  %v136_v40 = vld [vmem:[#allocation5 + $0x2f0] sm:$0xff]  ;;  %v151_v42 = vld [vmem:[#allocation5 + $0x368] sm:$0xff]  ;;  %v145_v43 = vld [vmem:[#allocation5 + $0x338] sm:$0xff]  ;;  %v2306_v45 = vpack.c.bf16 %v134_v37, %v126_v36  ;;  %v2527_v37 = vmov 2475754826  }
  0x4e   :  { %2321 = vmatprep.subr.bf16.mxu1 %v2320_v55  ;;  %376 = vmatprep.mubr.f32.mxu0 %v2525_v0  ;;  %v153_v44 = vld [vmem:[#allocation5 + $0x378] sm:$0xff]  ;;  %v2338_v46 = vpack.c.bf16 %v136_v40, %v128_v38  ;;  %v2308_v47 = vpack.c.bf16 %v151_v42, %v143_v41  ;;  %v142_v49 = vld [vmem:[#allocation5 + $0x320] sm:$0xff]  ;;  %v144_v51 = vld [vmem:[#allocation5 + $0x330] sm:$0xff]  ;;  %v2529_v41 = vmov 2102212464  }
  0x4f   :  { %447 = vmatprep.mubr.f32.mxu1 %v2525_v0  ;;  %v2330_v0 = vpack.c.bf16 %v104_v17, %v96_v15  ;;  %v150_v50 = vld [vmem:[#allocation5 + $0x360] sm:$0xff]  ;;  %v2340_v52 = vpack.c.bf16 %v153_v44, %v145_v43  ;;  %v152_v53 = vld [vmem:[#allocation5 + $0x370] sm:$0xff]  ;;  %v159_v54 = vld [vmem:[#allocation5 + $0x3a8] sm:$0xff]  ;;  %v2530_v43 = vmov 920167782  }
  0x50   :  { %2291 = vmatpush1.bf16.msra.mxu0 %v2290_v61  ;;  %v167_v55 = vld [vmem:[#allocation5 + $0x3e8] sm:$0xff]  ;;  %v161_v56 = vld [vmem:[#allocation5 + $0x3b8] sm:$0xff]  ;;  %v2310_v58 = vpack.c.bf16 %v150_v50, %v142_v49  ;;  %v2342_v59 = vpack.c.bf16 %v152_v53, %v144_v51  ;;  %v158_v61 = vld [vmem:[#allocation5 + $0x3a0] sm:$0xff]  ;;  %v2531_v51 = vmov 1326507024  }
  0x51   :  { %2323 = vmatpush1.bf16.msra.mxu1 %v2322_v62  ;;  %2293 = vmatprep.subr.bf16.mxu0 %v2292_v63  ;;  %v169_v57 = vld [vmem:[#allocation5 + $0x3f8] sm:$0xff]  ;;  %v2312_v60 = vpack.c.bf16 %v167_v55, %v159_v54  ;;  %v166_v62 = vld [vmem:[#allocation5 + $0x3e0] sm:$0xff]  ;;  %v160_v1 = vld [vmem:[#allocation5 + $0x3b0] sm:$0xff] }
  0x52   :  { %2325 = vmatprep.subr.bf16.mxu1 %v2324_v4  ;;  %v2344_v63 = vpack.c.bf16 %v169_v57, %v161_v56  ;;  %v168_v2 = vld [vmem:[#allocation5 + $0x3f0] sm:$0xff]  ;;  %v2314_v3 = vpack.c.bf16 %v166_v62, %v158_v61 }
  0x53   :  { %v2346_v4 = vpack.c.bf16 %v168_v2, %v160_v1 }
  0x54   :  { %2295 = vmatpush1.bf16.msra.mxu0 %v2294_v10 }
  0x55   :  { %2327 = vmatpush1.bf16.msra.mxu1 %v2326_v11  ;;  %2297 = vmatprep.subr.bf16.mxu0 %v2296_v12 }
  0x56   :  { %2329 = vmatprep.subr.bf16.mxu1 %v2328_v16 }
  0x58   :  { %2299 = vmatpush1.bf16.msra.mxu0 %v2298_v22 }
  0x59   :  { %2331 = vmatpush1.bf16.msra.mxu1 %v2330_v0  ;;  %2301 = vmatprep.subr.bf16.mxu0 %v2300_v23 }
  0x5a   :  { %2333 = vmatprep.subr.bf16.mxu1 %v2332_v27 }
  0x5c   :  { %2303 = vmatpush1.bf16.msra.mxu0 %v2302_v33  ;;  %v2526_v33 = vmov 683565275  }
  0x5d   :  { %2335 = vmatpush1.bf16.msra.mxu1 %v2334_v34  ;;  %2305 = vmatprep.subr.bf16.mxu0 %v2304_v35 }
  0x5e   :  { %2337 = vmatprep.subr.bf16.mxu1 %v2336_v39  ;;  %v2528_v39 = vmov 2131351028  }
  0x60   :  { %2307 = vmatpush1.bf16.msra.mxu0 %v2306_v45 }
  0x61   :  { %2339 = vmatpush1.bf16.msra.mxu1 %v2338_v46  ;;  %2309 = vmatprep.subr.bf16.mxu0 %v2308_v47 }
  0x62   :  { %2341 = vmatprep.subr.bf16.mxu1 %v2340_v52 }
  0x64   :  { %2311 = vmatpush1.bf16.msra.mxu0 %v2310_v58 }
  0x65   :  { %2343 = vmatpush1.bf16.msra.mxu1 %v2342_v59  ;;  %2313 = vmatprep.subr.bf16.mxu0 %v2312_v60 }
  0x66   :  { %2345 = vmatprep.subr.bf16.mxu1 %v2344_v63 }
  0x68   :  { %2315 = vmatpush1.bf16.msra.mxu0 %v2314_v3 }
  0x69   :  { %2347 = vmatpush1.bf16.msra.mxu1 %v2346_v4 }
  0x6b   :  { %377 = vmatmul.mubr.f32.vlgmr.msra.gmra.mrb[2].mxu0 %v2587_v48 }
  0x6c   :  { %448 = vmatmul.mubr.f32.vlgmr.msra.gmra.mrb[2].mxu1 %v2587_v48 }
 0x11e   :  { %v2595_v5 = vpop.f32.mrb[0].mxu0 }
 0x11f   :  { %v454_v6 = vand.u32 2147483647, %v2595_v5  ;;  %v457_v7 = vand.u32 2139095040, %v2595_v5  ;;  %v2599_v8 = vpop.f32.mrb[0].mxu1  ;;  %v2601_v9 = vpop.f32.mrb[1].mxu0  ;;  %vm456_vm13 = vcmp.lt.s32.totalorder %v2595_v5, 0 }
 0x120   :  { %v660_v10 = vand.u32 2147483647, %v2599_v8  ;;  %v663_v11 = vand.u32 2139095040, %v2599_v8  ;;  %v2605_v12 = vpop.f32.mrb[1].mxu1  ;;  %v560_v16 = vand.u32 2139095040, %v2601_v9 }
 0x121   :  { %v458_v13 = vshrl.u32 %v457_v7, 23  ;;  %v461_v48 = vand.u32 8388607, %v454_v6  ;;  %v557_v30 = vand.u32 2147483647, %v2601_v9 }
 0x122   :  { %v664_v14 = vshrl.u32 %v663_v11, 23  ;;  %v667_v15 = vand.u32 8388607, %v660_v10  ;;  %v561_v19 = vshrl.u32 %v560_v16, 23  ;;  %vm2717_vm14 = vcmp.le.f32.partialorder %v454_v6, 0.7853982 }
 0x123   :  { %v2156_v17 = vadd.s32 4294967169, %v458_v13  ;;  %v462_v21 = vor.u32 8388608, %v461_v48 }
 0x124   :  { %v2164_v18 = vadd.s32 4294967169, %v664_v14  ;;  %v668_v22 = vor.u32 8388608, %v667_v15  ;;  %v2160_v23 = vadd.s32 4294967169, %v561_v19 }
 0x125   :  { %v464_v20 = vadd.s32 1, %v2156_v17  ;;  %v2612_v28 = vshll.u32 %v462_v21, 8 }
 0x126   :  { %v670_v0 = vadd.s32 1, %v2164_v18  ;;  %v2614_v29 = vshll.u32 %v668_v22, 8  ;;  %v2617_v31 = vadd.s32 1, %v2160_v23 }
 0x127   :  { %vm465_vm0 = vcmp.gt.s32.totalorder %v464_v20, 0 }
 0x128   :  { %v466_v24 = vsel %vm465_vm0, %v464_v20, 0  ;;  %vm671_vm1 = vcmp.gt.s32.totalorder %v670_v0, 0  ;;  %vm568_vm6 = vcmp.gt.s32.totalorder %v2617_v31, 0 }
 0x129   :  { %v467_v25 = vshrl.u32 %v466_v24, 5  ;;  %v468_v26 = vand.u32 31, %v466_v24  ;;  %v672_v27 = vsel %vm671_vm1, %v670_v0, 0 }
 0x12a   :  { %v2620_v35 = vshrl.u32 %v672_v27, 5  ;;  %v674_v36 = vand.u32 31, %v672_v27 }
 0x12b   :  { %v469_v32 = vsub.s32 32, %v468_v26  ;;  %v471_v34 = vshll.u32 %v2526_v33, %v468_v26  ;;  %v474_v38 = vshll.u32 %v2527_v37, %v468_v26  ;;  %v477_v40 = vshll.u32 %v2528_v39, %v468_v26 }
 0x12c   :  { %v480_v42 = vshll.u32 %v2529_v41, %v468_v26  ;;  %v483_v44 = vshll.u32 %v2530_v43, %v468_v26  ;;  %vm486_vm2 = vcmp.lt.s32.totalorder %v467_v25, 1  ;;  %vm487_vm3 = vcmp.lt.s32.totalorder %v467_v25, 2 }
 0x12d   :  { %v472_v45 = vshrl.u32 %v2527_v37, %v469_v32  ;;  %v475_v46 = vshrl.u32 %v2528_v39, %v469_v32  ;;  %v478_v47 = vshrl.u32 %v2529_v41, %v469_v32  ;;  %v470_v49 = vshrl.u32 %v2526_v33, %v469_v32 }
 0x12e   :  { %v481_v50 = vshrl.u32 %v2530_v43, %v469_v32  ;;  %v484_v52 = vshrl.u32 %v2531_v51, %v469_v32  ;;  %v675_v56 = vsub.s32 32, %v674_v36  ;;  %vm488_vm4 = vcmp.lt.s32.totalorder %v467_v25, 3 }
 0x12f   :  { %v473_v53 = vor.u32 %v472_v45, %v471_v34  ;;  %v476_v54 = vor.u32 %v475_v46, %v474_v38  ;;  %v479_v55 = vor.u32 %v478_v47, %v477_v40  ;;  %vm489_vm5 = vcmp.lt.s32.totalorder %v467_v25, 4 }
 0x130   :  { %v482_v57 = vor.u32 %v481_v50, %v480_v42  ;;  %v485_v58 = vor.u32 %v484_v52, %v483_v44  ;;  %v677_v3 = vshll.u32 %v2526_v33, %v674_v36  ;;  %v678_v11 = vshrl.u32 %v2527_v37, %v675_v56 }
 0x131   :  { %v490_v59 = vsel %vm486_vm2, %v470_v49, %v473_v53  ;;  %v491_v60 = vsel %vm489_vm5, %v479_v55, 2102212464  ;;  %v494_v61 = vsel %vm486_vm2, %v473_v53, %v476_v54  ;;  %v498_v62 = vsel %vm486_vm2, %v476_v54, %v479_v55 }
 0x132   :  { %v492_v63 = vsel %vm488_vm4, %v476_v54, %v491_v60  ;;  %v495_v1 = vsel %vm489_vm5, %v482_v57, 920167782  ;;  %v499_v2 = vsel %vm489_vm5, %v485_v58, 1326507024  ;;  %v680_v13 = vshll.u32 %v2527_v37, %v674_v36 }
 0x133   :  { %v496_v4 = vsel %vm488_vm4, %v479_v55, %v495_v1  ;;  %v500_v7 = vsel %vm488_vm4, %v482_v57, %v499_v2  ;;  %v493_v48 = vsel %vm487_vm3, %v490_v59, %v492_v63  ;;  %v681_v16 = vshrl.u32 %v2528_v39, %v675_v56 }
 0x134   :  { %v497_v14 = vsel %vm487_vm3, %v494_v61, %v496_v4  ;;  %v501_v15 = vsel %vm487_vm3, %v498_v62, %v500_v7  ;;  %v679_v21 = vor.u32 %v678_v11, %v677_v3  ;;  %v683_v0 = vshll.u32 %v2528_v39, %v674_v36 }
 0x135   :  { %v2644_v17 = vmul.u32.u64.low %v2612_v28, %v501_v15  ;;  %v2645_v18 = vmul.u32.u64.high %v2612_v28, %v501_v15, %v2644_v17  ;;  %v2648_v19 = vmul.u32.u64.low %v2612_v28, %v497_v14  ;;  %v2649_v20 = vmul.u32.u64.high %v2612_v28, %v497_v14, %v2648_v19 }
 0x136   :  { %v682_v22 = vor.u32 %v681_v16, %v680_v13  ;;  %v684_v23 = vshrl.u32 %v2529_v41, %v675_v56  ;;  %v676_v24 = vshrl.u32 %v2526_v33, %v675_v56  ;;  %v686_v25 = vshll.u32 %v2529_v41, %v674_v36 }
 0x137   :  { %v687_v26 = vshrl.u32 %v2530_v43, %v675_v56  ;;  %v690_v27 = vshrl.u32 %v2531_v51, %v675_v56  ;;  %v509_v32 = vmul.u32 %v2612_v28, %v493_v48  ;;  %v689_v38 = vshll.u32 %v2530_v43, %v674_v36 }
 0x138   :  { %v685_v34 = vor.u32 %v684_v23, %v683_v0  ;;  %vm692_vm7 = vcmp.lt.s32.totalorder %v2620_v35, 1  ;;  %vm511_vm8 = vc.u32 %v2645_v18, %v2648_v19  ;;  %v512_v40 = vadd.s32 1, %v2649_v20 }
 0x139   :  { %v688_v42 = vor.u32 %v687_v26, %v686_v25  ;;  %vm693_vm9 = vcmp.lt.s32.totalorder %v2620_v35, 2  ;;  %v691_v44 = vor.u32 %v690_v27, %v689_v38  ;;  %vm694_vm10 = vcmp.lt.s32.totalorder %v2620_v35, 3 }
 0x13a   :  { %vm695_vm11 = vcmp.lt.s32.totalorder %v2620_v35, 4  ;;  %v700_v45 = vsel %vm692_vm7, %v679_v21, %v682_v22  ;;  %v513_v28 = vsel %vm511_vm8, %v512_v40, %v2649_v20  ;;  %v704_v47 = vsel %vm692_vm7, %v682_v22, %v685_v34 }
 0x13b   :  { %v697_v46 = vsel %vm695_vm11, %v685_v34, 2102212464  ;;  %v701_v36 = vsel %vm695_vm11, %v688_v42, 920167782  ;;  %v514_v49 = vadd.s32 %v513_v28, %v509_v32  ;;  %v696_v50 = vsel %vm692_vm7, %v676_v24, %v679_v21 }
 0x13c   :  { %v702_v52 = vsel %vm694_vm10, %v685_v34, %v701_v36  ;;  %v705_v53 = vsel %vm695_vm11, %v691_v44, 1326507024  ;;  %v698_v54 = vsel %vm694_vm10, %v682_v22, %v697_v46  ;;  %v569_v57 = vsel %vm568_vm6, %v2617_v31, 0 }
 0x13d   :  { %v703_v55 = vsel %vm693_vm9, %v700_v45, %v702_v52  ;;  %v706_v56 = vsel %vm694_vm10, %v688_v42, %v705_v53  ;;  %v515_v58 = vadd.s32 536870912, %v514_v49  ;;  %v699_v4 = vsel %vm693_vm9, %v696_v50, %v698_v54 }
 0x13e   :  { %v707_v59 = vsel %vm693_vm9, %v704_v47, %v706_v56  ;;  %v2676_v60 = vmul.u32.u64.low %v2614_v29, %v703_v55  ;;  %v2677_v61 = vmul.u32.u64.high %v2614_v29, %v703_v55, %v2676_v60  ;;  %v2680_v62 = vpop.f32.mrb[2].mxu0  ;;  %v564_v7 = vand.u32 8388607, %v557_v30 }
 0x13f   :  { %v2683_v63 = vmul.u32.u64.low %v2614_v29, %v707_v59  ;;  %v2684_v1 = vmul.u32.u64.high %v2614_v29, %v707_v59, %v2683_v63  ;;  %v2686_v2 = vpop.f32.mrb[2].mxu1  ;;  %v2688_v3 = vpop.f32.mrb[3].mxu0  ;;  %v516_v31 = vshrl.u32 %v515_v58, 30  ;;  %v766_v11 = vand.u32 2139095040, %v2605_v12 }
 0x140   :  { %v2695_v13 = vpop.f32.mrb[3].mxu1  ;;  %v571_v48 = vand.u32 31, %v569_v57  ;;  %v718_v15 = vadd.s32 1, %v2677_v61  ;;  %v715_v16 = vmul.u32 %v2614_v29, %v699_v4  ;;  %v565_v20 = vor.u32 8388608, %v564_v7 }
 0x141   :  { %v517_v14 = vshll.u32 %v516_v31, 30  ;;  %vm717_vm12 = vc.u32 %v2684_v1, %v2676_v60  ;;  %v767_v21 = vshrl.u32 %v766_v11, 23  ;;  %v2702_v24 = vshrl.u32 %v569_v57, 5 }
 0x142   :  { %v719_v35 = vsel %vm717_vm12, %v718_v15, %v2677_v61  ;;  %v572_v0 = vsub.s32 32, %v571_v48  ;;  %v763_v26 = vand.u32 2147483647, %v2605_v12  ;;  %v510_v29 = vadd.s32 %v2648_v19, %v2645_v18 }
 0x143   :  { %v518_v17 = vsub.s32 %v514_v49, %v517_v14  ;;  %v720_v22 = vadd.s32 %v719_v35, %v715_v16  ;;  %v2708_v32 = vshll.u32 %v565_v20, 8  ;;  %v2168_v34 = vadd.s32 4294967169, %v767_v21 }
 0x144   :  { %v575_v40 = vshrl.u32 %v2527_v37, %v572_v0  ;;  %v578_v42 = vshrl.u32 %v2528_v39, %v572_v0  ;;  %v581_v44 = vshrl.u32 %v2529_v41, %v572_v0  ;;  %v583_v18 = vshll.u32 %v2529_v41, %v571_v48 }
 0x145   :  { %v520_v23 = vsub.s32 0, %v518_v17  ;;  %v721_v25 = vadd.s32 536870912, %v720_v22  ;;  %v584_v19 = vshrl.u32 %v2530_v43, %v572_v0  ;;  %vm592_vm15 = vcmp.lt.s32.totalorder %v2702_v24, 4 }
 0x146   :  { %v574_v36 = vshll.u32 %v2526_v33, %v571_v48  ;;  %v577_v47 = vshll.u32 %v2527_v37, %v571_v48  ;;  %v580_v49 = vshll.u32 %v2528_v39, %v571_v48  ;;  %v540_v6 = vsub.s32 4, %v516_v31 }
 0x147   :  { %v2157_v27 = vmin.u32 %v520_v23, %v518_v17  ;;  %v2710_v38 = vshrl.u32 %v721_v25, 30  ;;  %v585_v52 = vor.u32 %v584_v19, %v583_v18  ;;  %v587_v53 = vshrl.u32 %v2531_v51, %v572_v0 }
 0x148   :  { %v576_v55 = vor.u32 %v575_v40, %v574_v36  ;;  %v579_v56 = vor.u32 %v578_v42, %v577_v47  ;;  %v582_v57 = vor.u32 %v581_v44, %v580_v49  ;;  %v586_v58 = vshll.u32 %v2530_v43, %v571_v48 }
 0x149   :  { %v522_v28 = vclz %v2157_v27  ;;  %v723_v46 = vshll.u32 %v2710_v38, 30  ;;  %vm589_vm1 = vcmp.lt.s32.totalorder %v2702_v24, 1  ;;  %v598_v59 = vsel %vm592_vm15, %v585_v52, 920167782 }
 0x14a   :  { %vm590_vm2 = vcmp.lt.s32.totalorder %v2702_v24, 2  ;;  %vm591_vm3 = vcmp.lt.s32.totalorder %v2702_v24, 3  ;;  %v541_v11 = vsel %vm456_vm13, %v540_v6, %v516_v31  ;;  %v588_v14 = vor.u32 %v587_v53, %v586_v58 }
 0x14b   :  { %v2158_v50 = vadd.s32 4294967294, %v522_v28  ;;  %v2729_v54 = vsub.s32 %v720_v22, %v723_v46  ;;  %vm662_vm4 = vcmp.lt.s32.totalorder %v2599_v8, 0  ;;  %v716_v48 = vadd.s32 %v2676_v60, %v2684_v1 }
 0x14c   :  { %v597_v16 = vsel %vm589_vm1, %v576_v55, %v579_v56  ;;  %v599_v35 = vsel %vm591_vm3, %v582_v57, %v598_v59  ;;  %v594_v31 = vsel %vm592_vm15, %v582_v57, 2102212464  ;;  %v543_v23 = vsel %vm2717_vm14, 0, %v541_v11 }
 0x14d   :  { %vm2159_vm0 = vcmp.lt.s32.totalorder %v2158_v50, 0  ;;  %v726_v63 = vsub.s32 0, %v2729_v54  ;;  %v573_v60 = vshrl.u32 %v2526_v33, %v572_v0  ;;  %v601_v1 = vsel %vm589_vm1, %v579_v56, %v582_v57 }
 0x14e   :  { %v525_v61 = vsel %vm2159_vm0, 0, %v2158_v50  ;;  %v600_v42 = vsel %vm590_vm2, %v597_v16, %v599_v35  ;;  %vm2761_vm5 = vcmp.le.f32.partialorder %v660_v10, 0.7853982  ;;  %v746_v0 = vsub.s32 4, %v2710_v38 }
 0x14f   :  { %v526_v4 = vsub.s32 32, %v525_v61  ;;  %v530_v7 = vsub.s32 4294967266, %v525_v61  ;;  %v2165_v15 = vmin.u32 %v726_v63, %v2729_v54  ;;  %v527_v20 = vshll.u32 %v518_v17, %v525_v61 }
 0x150   :  { %v602_v17 = vsel %vm592_vm15, %v588_v14, 1326507024  ;;  %v593_v28 = vsel %vm589_vm1, %v573_v60, %v576_v55  ;;  %v595_v18 = vsel %vm591_vm3, %v579_v56, %v594_v31  ;;  %v773_v47 = vadd.s32 1, %v2168_v34 }
 0x151   :  { %v528_v21 = vshrl.u32 %v510_v29, %v526_v4  ;;  %v531_v22 = vadd.s32 127, %v530_v7  ;;  %v728_v25 = vclz %v2165_v15  ;;  %v603_v36 = vsel %vm591_vm3, %v585_v52, %v602_v17 }
 0x152   :  { %v604_v10 = vsel %vm590_vm2, %v601_v1, %v603_v36  ;;  %v2775_v49 = vmul.u32.u64.low %v2708_v32, %v600_v42  ;;  %v2776_v50 = vmul.u32.u64.high %v2708_v32, %v600_v42, %v2775_v49  ;;  %v596_v34 = vsel %vm590_vm2, %v593_v28, %v595_v18 }
 0x153   :  { %v529_v27 = vor.u32 %v528_v21, %v527_v20  ;;  %v532_v40 = vshll.u32 %v531_v22, 23  ;;  %v2166_v44 = vadd.s32 4294967294, %v728_v25  ;;  %vm774_vm7 = vcmp.gt.s32.totalorder %v773_v47, 0 }
 0x154   :  { %v2780_v55 = vmul.u32.u64.low %v2708_v32, %v604_v10  ;;  %v2781_v56 = vmul.u32.u64.high %v2708_v32, %v604_v10, %v2780_v55  ;;  %v1379_v59 = vadd.s32 3, %v543_v23  ;;  %v747_v61 = vsel %vm662_vm4, %v746_v0, %v2710_v38 }
 0x155   :  { %v533_v19 = vor.u32 4788187, %v532_v40  ;;  %v536_v46 = vcvt.s32.f32 %v529_v27  ;;  %vm2167_vm6 = vcmp.lt.s32.totalorder %v2166_v44, 0  ;;  %v775_v63 = vsel %vm774_vm7, %v773_v47, 0 }
 0x156   :  { %v731_v53 = vsel %vm2167_vm6, 0, %v2166_v44  ;;  %v615_v14 = vadd.s32 1, %v2776_v50  ;;  %v612_v16 = vmul.u32 %v2708_v32, %v596_v34  ;;  %vm614_vm8 = vc.u32 %v2781_v56, %v2775_v49 }
 0x157   :  { %v534_v6 = vand.u32 2147483647, %v533_v19  ;;  %v732_v57 = vsub.s32 32, %v731_v53  ;;  %v736_v58 = vsub.s32 4294967266, %v731_v53  ;;  %v733_v4 = vshll.u32 %v2729_v54, %v731_v53 }
 0x158   :  { %v777_v24 = vand.u32 31, %v775_v63  ;;  %v616_v21 = vsel %vm614_vm8, %v615_v14, %v2776_v50  ;;  %v770_v38 = vand.u32 8388607, %v763_v26  ;;  %v2803_v60 = vand.u32 3, %v543_v23 }
 0x159   :  { %v537_v52 = vmul.f32 %v536_v46, %v534_v6  ;;  %v734_v7 = vshrl.u32 %v716_v48, %v732_v57  ;;  %v737_v11 = vadd.s32 127, %v736_v58  ;;  %v749_v48 = vsel %vm2761_vm5, 0, %v747_v61 }
 0x15a   :  { %v617_v22 = vadd.s32 %v616_v21, %v612_v16  ;;  %v778_v31 = vsub.s32 32, %v777_v24  ;;  %v2805_v1 = vand.u32 3, %v1379_v59  ;;  %v1587_v17 = vadd.s32 3, %v749_v48 }
 0x15b   :  { %v538_v15 = vxor.u32 2147483648, %v537_v52  ;;  %v735_v35 = vor.u32 %v734_v7, %v733_v4  ;;  %v738_v20 = vshll.u32 %v737_v11, 23  ;;  %v771_v0 = vor.u32 8388608, %v770_v38 }
 0x15c   :  { %v618_v27 = vadd.s32 536870912, %v617_v22  ;;  %v2809_v28 = vshrl.u32 %v775_v63, 5  ;;  %v787_v18 = vshrl.u32 %v2529_v41, %v778_v31  ;;  %v781_v19 = vshrl.u32 %v2527_v37, %v778_v31 }
 0x15d   :  { %v539_v54 = vsel %vm456_vm13, %v538_v15, %v537_v52  ;;  %v739_v25 = vor.u32 4788187, %v738_v20  ;;  %v742_v42 = vcvt.s32.f32 %v735_v35  ;;  %v789_v23 = vshll.u32 %v2529_v41, %v777_v24 }
 0x15e   :  { %v542_v32 = vsel %vm2717_vm14, %v2595_v5, %v539_v54  ;;  %v2807_v44 = vshrl.u32 %v618_v27, 30  ;;  %v790_v46 = vshrl.u32 %v2530_v43, %v778_v31  ;;  %vm552_vm9 = vcmp.eq.s32.totalorder %v2803_v60, 2 }
 0x15f   :  { %2393 = vcosq.f32 %v542_v32  ;;  %v740_v40 = vand.u32 2147483647, %v739_v25  ;;  %vm1385_vm10 = vcmp.eq.s32.totalorder %v2805_v1, 2  ;;  %v2817_v36 = vand.u32 3, %v749_v48 }
 0x160   :  { %2395 = vsinq.f32 %v542_v32  ;;  %v620_v47 = vshll.u32 %v2807_v44, 30  ;;  %v784_v10 = vshrl.u32 %v2528_v39, %v778_v31  ;;  %v786_v50 = vshll.u32 %v2528_v39, %v777_v24 }
 0x161   :  { %v743_v45 = vmul.f32 %v742_v42, %v740_v40  ;;  %vm549_vm11 = vcmp.eq.s32.totalorder %v2803_v60, 0  ;;  %vm1382_vm12 = vcmp.eq.s32.totalorder %v2805_v1, 0  ;;  %v2824_v53 = vand.u32 3, %v1587_v17 }
 0x162   :  { %v780_v55 = vshll.u32 %v2526_v33, %v777_v24  ;;  %v791_v57 = vor.u32 %v790_v46, %v789_v23  ;;  %vm548_vm13 = vcmp.lt.s32.totalorder %v2803_v60, 2  ;;  %vm1381_vm14 = vcmp.lt.s32.totalorder %v2805_v1, 2 }
 0x163   :  { %v744_v6 = vxor.u32 2147483648, %v743_v45  ;;  %v2829_v58 = vsub.s32 %v617_v22, %v620_v47  ;;  %v783_v34 = vshll.u32 %v2527_v37, %v777_v24  ;;  %v788_v52 = vor.u32 %v787_v18, %v786_v50 }
 0x164   :  { %v2832_v59 = vshll.u32 %v771_v0, 8  ;;  %vm546_vm15 = vweird.f32 %v2595_v5  ;;  %v782_v63 = vor.u32 %v781_v19, %v780_v55  ;;  %v793_v4 = vshrl.u32 %v2531_v51, %v778_v31 }
 0x165   :  { %v745_v61 = vsel %vm662_vm4, %v744_v6, %v743_v45  ;;  %vm795_vm0 = vcmp.lt.s32.totalorder %v2809_v28, 1  ;;  %v623_v11 = vsub.s32 0, %v2829_v58  ;;  %v785_v14 = vor.u32 %v784_v10, %v783_v34 }
 0x166   :  { %v748_v7 = vsel %vm2761_vm5, %v2599_v8, %v745_v61  ;;  %vm798_vm1 = vcmp.lt.s32.totalorder %v2809_v28, 4  ;;  %v779_v15 = vshrl.u32 %v2526_v33, %v778_v31  ;;  %v792_v16 = vshll.u32 %v2530_v43, %v777_v24 }
 0x167   :  { %2397 = vcosq.f32 %v748_v7  ;;  %v804_v35 = vsel %vm798_vm1, %v791_v57, 920167782  ;;  %v2161_v21 = vmin.u32 %v623_v11, %v2829_v58  ;;  %v643_v29 = vsub.s32 4, %v2807_v44 }
 0x168   :  { %2399 = vsinq.f32 %v748_v7  ;;  %v800_v38 = vsel %vm798_vm1, %v788_v52, 2102212464  ;;  %v794_v22 = vor.u32 %v793_v4, %v792_v16  ;;  %vm796_vm2 = vcmp.lt.s32.totalorder %v2809_v28, 2 }
 0x169   :  { %v2394_v20 = vpop.eup %2393  ;;  %vm797_vm3 = vcmp.lt.s32.totalorder %v2809_v28, 3  ;;  %vm559_vm4 = vcmp.lt.s32.totalorder %v2601_v9, 0  ;;  %v625_v31 = vclz %v2161_v21  ;;  %v803_v32 = vsel %vm795_vm0, %v782_v63, %v785_v14 }
 0x16a   :  { %v2396_v54 = vpop.eup %2395  ;;  %v553_v48 = vxor.u32 2147483648, %v2394_v20  ;;  %v805_v25 = vsel %vm797_vm3, %v788_v52, %v804_v35  ;;  %vm758_vm5 = vcmp.eq.s32.totalorder %v2817_v36, 2  ;;  %v799_v42 = vsel %vm795_vm0, %v779_v15, %v782_v63 }
 0x16b   :  { %v550_v24 = vxor.u32 2147483648, %v2396_v54  ;;  %v801_v17 = vsel %vm797_vm3, %v785_v14, %v800_v38  ;;  %vm755_vm6 = vcmp.eq.s32.totalorder %v2817_v36, 0  ;;  %v2162_v45 = vadd.s32 4294967294, %v625_v31 }
 0x16c   :  { %v554_v27 = vsel %vm552_vm9, %v553_v48, %v2396_v54  ;;  %v1387_v40 = vsel %vm1385_vm10, %v553_v48, %v2396_v54  ;;  %v807_v19 = vsel %vm795_vm0, %v785_v14, %v788_v52  ;;  %vm754_vm7 = vcmp.lt.s32.totalorder %v2817_v36, 2 }
 0x16d   :  { %v551_v0 = vsel %vm549_vm11, %v2394_v20, %v550_v24  ;;  %v1384_v18 = vsel %vm1382_vm12, %v2394_v20, %v550_v24  ;;  %vm1589_vm8 = vcmp.lt.s32.totalorder %v2824_v53, 2  ;;  %v806_v47 = vsel %vm796_vm2, %v803_v32, %v805_v25 }
 0x16e   :  { %v555_v23 = vsel %vm548_vm13, %v551_v0, %v554_v27  ;;  %v1388_v46 = vsel %vm1381_vm14, %v1384_v18, %v1387_v40  ;;  %v808_v10 = vsel %vm798_vm1, %v794_v22, 1326507024  ;;  %vm752_vm9 = vweird.f32 %v2599_v8 }
 0x16f   :  { %v556_v50 = vsel %vm546_vm15, nan, %v555_v23  ;;  %v1389_v60 = vsel %vm546_vm15, nan, %v1388_v46  ;;  %vm2163_vm10 = vcmp.lt.s32.totalorder %v2162_v45, 0  ;;  %v809_v1 = vsel %vm797_vm3, %v791_v57, %v808_v10 }
 0x170   :  { %1278 = vst [vmem:[#allocation7] sm:$0xff] %v556_v50  ;;  %2118 = vst [vmem:[#allocation8] sm:$0xff] %v1389_v60  ;;  %v628_v6 = vsel %vm2163_vm10, 0, %v2162_v45  ;;  %v810_v55 = vsel %vm796_vm2, %v807_v19, %v809_v1  ;;  %v2895_v34 = vmul.u32.u64.low %v2832_v59, %v806_v47  ;;  %v2896_v52 = vmul.u32.u64.high %v2832_v59, %v806_v47, %v2895_v34 }
 0x171   :  { %vm1590_vm11 = vcmp.eq.s32.totalorder %v2824_v53, 0  ;;  %v613_v5 = vadd.s32 %v2775_v49, %v2781_v56  ;;  %v629_v61 = vsub.s32 32, %v628_v6  ;;  %v633_v63 = vsub.s32 4294967266, %v628_v6  ;;  %v2398_v4 = vpop.eup %2397 }
 0x172   :  { %vm1593_vm12 = vcmp.eq.s32.totalorder %v2824_v53, 2  ;;  %v802_v57 = vsel %vm796_vm2, %v799_v42, %v801_v17  ;;  %v2906_v7 = vmul.u32.u64.low %v2832_v59, %v810_v55  ;;  %v2907_v11 = vmul.u32.u64.high %v2832_v59, %v810_v55, %v2906_v7  ;;  %v2400_v14 = vpop.eup %2399 }
 0x173   :  { %v759_v15 = vxor.u32 2147483648, %v2398_v4  ;;  %v630_v16 = vshll.u32 %v2829_v58, %v628_v6  ;;  %v631_v35 = vshrl.u32 %v613_v5, %v629_v61  ;;  %v634_v20 = vadd.s32 127, %v633_v63 }
 0x174   :  { %v756_v21 = vxor.u32 2147483648, %v2400_v14  ;;  %v644_v49 = vsel %vm559_vm4, %v643_v29, %v2807_v44  ;;  %v821_v56 = vadd.s32 1, %v2896_v52  ;;  %v869_v28 = vand.u32 2139095040, %v2680_v62 }
 0x175   :  { %v760_v38 = vsel %vm758_vm5, %v759_v15, %v2400_v14  ;;  %v1595_v54 = vsel %vm1593_vm12, %v759_v15, %v2400_v14  ;;  %v632_v48 = vor.u32 %v631_v35, %v630_v16  ;;  %v635_v22 = vshll.u32 %v634_v20, 23 }
 0x176   :  { %v757_v58 = vsel %vm755_vm6, %v2398_v4, %v756_v21  ;;  %v1592_v24 = vsel %vm1590_vm11, %v2398_v4, %v756_v21  ;;  %v818_v31 = vmul.u32 %v2832_v59, %v802_v57  ;;  %vm820_vm13 = vc.u32 %v2907_v11, %v2895_v34 }
 0x177   :  { %v761_v44 = vsel %vm754_vm7, %v757_v58, %v760_v38  ;;  %v1596_v29 = vsel %vm1589_vm8, %v1592_v24, %v1595_v54  ;;  %v636_v32 = vor.u32 4788187, %v635_v22  ;;  %v866_v25 = vand.u32 2147483647, %v2680_v62 }
 0x178   :  { %v762_v27 = vsel %vm752_vm9, nan, %v761_v44  ;;  %v1597_v40 = vsel %vm752_vm9, nan, %v1596_v29  ;;  %v822_v59 = vsel %vm820_vm13, %v821_v56, %v2896_v52  ;;  %v870_v42 = vshrl.u32 %v869_v28, 23 }
 0x179   :  { %1280 = vst [vmem:[#allocation7 + $0x10] sm:$0xff] %v762_v27  ;;  %2120 = vst [vmem:[#allocation8 + $0x10] sm:$0xff] %v1597_v40  ;;  %vm2936_vm14 = vcmp.le.f32.partialorder %v557_v30, 0.7853982  ;;  %v637_v53 = vand.u32 2147483647, %v636_v32  ;;  %v639_v17 = vcvt.s32.f32 %v632_v48  ;;  %v823_v0 = vadd.s32 %v822_v59, %v818_v31 }
 0x17a   :  { %v646_v18 = vsel %vm2936_vm14, 0, %v644_v49  ;;  %v2172_v45 = vadd.s32 4294967169, %v870_v42  ;;  %v1075_v8 = vand.u32 2139095040, %v2686_v2  ;;  %v873_v46 = vand.u32 8388607, %v866_v25 }
 0x17b   :  { %v640_v19 = vmul.f32 %v639_v17, %v637_v53  ;;  %v824_v23 = vadd.s32 536870912, %v823_v0  ;;  %v1483_v30 = vadd.s32 3, %v646_v18  ;;  %v2950_v5 = vand.u32 3, %v646_v18 }
 0x17c   :  { %v876_v47 = vadd.s32 1, %v2172_v45  ;;  %v1076_v60 = vshrl.u32 %v1075_v8, 23  ;;  %v874_v61 = vor.u32 8388608, %v873_v46  ;;  %v1072_v7 = vand.u32 2147483647, %v2686_v2 }
 0x17d   :  { %v641_v10 = vxor.u32 2147483648, %v640_v19  ;;  %v825_v50 = vshrl.u32 %v824_v23, 30  ;;  %v2952_v4 = vand.u32 3, %v1483_v30  ;;  %vm765_vm0 = vcmp.lt.s32.totalorder %v2605_v12, 0 }
 0x17e   :  { %vm877_vm15 = vcmp.gt.s32.totalorder %v876_v47, 0  ;;  %v2180_v15 = vadd.s32 4294967169, %v1076_v60  ;;  %v819_v16 = vadd.s32 %v2895_v34, %v2907_v11  ;;  %v2963_v56 = vshll.u32 %v874_v61, 8 }
 0x17f   :  { %v642_v1 = vsel %vm559_vm4, %v641_v10, %v640_v19  ;;  %v826_v6 = vshll.u32 %v825_v50, 30  ;;  %v878_v55 = vsel %vm877_vm15, %v876_v47, 0  ;;  %v849_v20 = vsub.s32 4, %v825_v50 }
 0x180   :  { %v645_v52 = vsel %vm2936_vm14, %v2601_v9, %v642_v1  ;;  %v880_v63 = vand.u32 31, %v878_v55  ;;  %vm655_vm1 = vcmp.eq.s32.totalorder %v2950_v5, 2  ;;  %vm1489_vm2 = vcmp.eq.s32.totalorder %v2952_v4, 2 }
 0x181   :  { %2401 = vcosq.f32 %v645_v52  ;;  %v2954_v57 = vsub.s32 %v823_v0, %v826_v6  ;;  %v2968_v38 = vshrl.u32 %v878_v55, 5  ;;  %v2973_v34 = vand.u32 8388607, %v1072_v7 }
 0x182   :  { %2403 = vsinq.f32 %v645_v52  ;;  %v881_v14 = vsub.s32 32, %v880_v63  ;;  %v883_v54 = vshll.u32 %v2526_v33, %v880_v63  ;;  %vm652_vm3 = vcmp.eq.s32.totalorder %v2950_v5, 0 }
 0x183   :  { %v829_v35 = vsub.s32 0, %v2954_v57  ;;  %vm1486_vm4 = vcmp.eq.s32.totalorder %v2952_v4, 0  ;;  %v886_v11 = vshll.u32 %v2527_v37, %v880_v63  ;;  %v889_v48 = vshll.u32 %v2528_v39, %v880_v63 }
 0x184   :  { %v884_v21 = vshrl.u32 %v2527_v37, %v881_v14  ;;  %v887_v49 = vshrl.u32 %v2528_v39, %v881_v14  ;;  %v890_v22 = vshrl.u32 %v2529_v41, %v881_v14  ;;  %v2980_v58 = vadd.s32 1, %v2180_v15 }
 0x185   :  { %v2169_v28 = vmin.u32 %v829_v35, %v2954_v57  ;;  %vm651_vm5 = vcmp.lt.s32.totalorder %v2950_v5, 2  ;;  %vm1485_vm6 = vcmp.lt.s32.totalorder %v2952_v4, 2  ;;  %v892_v44 = vshll.u32 %v2529_v41, %v880_v63 }
 0x186   :  { %v885_v31 = vor.u32 %v884_v21, %v883_v54  ;;  %v893_v29 = vshrl.u32 %v2530_v43, %v881_v14  ;;  %vm649_vm7 = vweird.f32 %v2601_v9  ;;  %v850_v32 = vsel %vm765_vm0, %v849_v20, %v825_v50 }
 0x187   :  { %v831_v24 = vclz %v2169_v28  ;;  %v882_v27 = vshrl.u32 %v2526_v33, %v881_v14  ;;  %v888_v40 = vor.u32 %v887_v49, %v886_v11  ;;  %v891_v59 = vor.u32 %v890_v22, %v889_v48 }
 0x188   :  { %v894_v36 = vor.u32 %v893_v29, %v892_v44  ;;  %v895_v53 = vshll.u32 %v2530_v43, %v880_v63  ;;  %v896_v17 = vshrl.u32 %v2531_v51, %v881_v14  ;;  %vm898_vm8 = vcmp.lt.s32.totalorder %v2968_v38, 1 }
 0x189   :  { %v2170_v42 = vadd.s32 4294967294, %v831_v24  ;;  %vm899_vm9 = vcmp.lt.s32.totalorder %v2968_v38, 2  ;;  %vm900_vm10 = vcmp.lt.s32.totalorder %v2968_v38, 3  ;;  %vm901_vm11 = vcmp.lt.s32.totalorder %v2968_v38, 4 }
 0x18a   :  { %vm2998_vm12 = vcmp.le.f32.partialorder %v763_v26, 0.7853982  ;;  %v897_v45 = vor.u32 %v896_v17, %v895_v53  ;;  %v902_v8 = vsel %vm898_vm8, %v882_v27, %v885_v31  ;;  %v903_v19 = vsel %vm901_vm11, %v891_v59, 2102212464 }
 0x18b   :  { %v2402_v0 = vpop.eup %2401  ;;  %vm2171_vm13 = vcmp.lt.s32.totalorder %v2170_v42, 0  ;;  %v906_v10 = vsel %vm898_vm8, %v885_v31, %v888_v40  ;;  %v907_v26 = vsel %vm901_vm11, %v894_v36, 920167782  ;;  %v904_v1 = vsel %vm900_vm10, %v888_v40, %v903_v19 }
 0x18c   :  { %v2404_v23 = vpop.eup %2403  ;;  %v656_v46 = vxor.u32 2147483648, %v2402_v0  ;;  %v834_v47 = vsel %vm2171_vm13, 0, %v2170_v42  ;;  %v908_v61 = vsel %vm900_vm10, %v891_v59, %v907_v26  ;;  %v910_v49 = vsel %vm898_vm8, %v888_v40, %v891_v59 }
 0x18d   :  { %v653_v30 = vxor.u32 2147483648, %v2404_v23  ;;  %v835_v50 = vsub.s32 32, %v834_v47  ;;  %v839_v60 = vsub.s32 4294967266, %v834_v47  ;;  %v836_v52 = vshll.u32 %v2954_v57, %v834_v47 }
 0x18e   :  { %v657_v6 = vsel %vm655_vm1, %v656_v46, %v2404_v23  ;;  %v1491_v55 = vsel %vm1489_vm2, %v656_v46, %v2404_v23  ;;  %v909_v57 = vsel %vm899_vm9, %v906_v10, %v908_v61  ;;  %v911_v5 = vsel %vm901_vm11, %v897_v45, 1326507024 }
 0x18f   :  { %v654_v63 = vsel %vm652_vm3, %v2402_v0, %v653_v30  ;;  %v1488_v14 = vsel %vm1486_vm4, %v2402_v0, %v653_v30  ;;  %v837_v15 = vshrl.u32 %v819_v16, %v835_v50  ;;  %v840_v35 = vadd.s32 127, %v839_v60 }
 0x190   :  { %v658_v20 = vsel %vm651_vm5, %v654_v63, %v657_v6  ;;  %v1492_v21 = vsel %vm1485_vm6, %v1488_v14, %v1491_v55  ;;  %v3038_v4 = vmul.u32.u64.low %v2963_v56, %v909_v57  ;;  %v3039_v48 = vmul.u32.u64.high %v2963_v56, %v909_v57, %v3038_v4 }
 0x191   :  { %v659_v28 = vsel %vm649_vm7, nan, %v658_v20  ;;  %v1493_v54 = vsel %vm649_vm7, nan, %v1492_v21  ;;  %v838_v16 = vor.u32 %v837_v15, %v836_v52  ;;  %v841_v11 = vshll.u32 %v840_v35, 23 }
 0x192   :  { %1279 = vst [vmem:[#allocation7 + $0x8] sm:$0xff] %v659_v28  ;;  %2119 = vst [vmem:[#allocation8 + $0x8] sm:$0xff] %v1493_v54  ;;  %v1080_v22 = vor.u32 8388608, %v2973_v34  ;;  %v912_v31 = vsel %vm900_vm10, %v894_v36, %v911_v5  ;;  %vm1083_vm14 = vcmp.gt.s32.totalorder %v2980_v58, 0  ;;  %v972_v9 = vand.u32 2139095040, %v2688_v3 }
 0x193   :  { %v842_v24 = vor.u32 4788187, %v841_v11  ;;  %v852_v44 = vsel %vm2998_vm12, 0, %v850_v32  ;;  %v905_v29 = vsel %vm899_vm9, %v902_v8, %v904_v1  ;;  %v913_v27 = vsel %vm899_vm9, %v910_v49, %v912_v31 }
 0x194   :  { %v1084_v40 = vsel %vm1083_vm14, %v2980_v58, 0  ;;  %v845_v59 = vcvt.s32.f32 %v838_v16  ;;  %v3055_v42 = vmul.u32.u64.low %v2963_v56, %v913_v27  ;;  %v3056_v36 = vmul.u32.u64.high %v2963_v56, %v913_v27, %v3055_v42 }
 0x195   :  { %v843_v34 = vand.u32 2147483647, %v842_v24  ;;  %v924_v53 = vadd.s32 1, %v3039_v48  ;;  %v1086_v17 = vand.u32 31, %v1084_v40  ;;  %v1691_v45 = vadd.s32 3, %v852_v44 }
 0x196   :  { %v921_v32 = vmul.u32 %v2963_v56, %v905_v29  ;;  %v3060_v19 = vshll.u32 %v1080_v22, 8  ;;  %v3062_v8 = vshrl.u32 %v1084_v40, 5  ;;  %v973_v23 = vshrl.u32 %v972_v9, 23 }
 0x197   :  { %v846_v0 = vmul.f32 %v845_v59, %v843_v34  ;;  %v1087_v38 = vsub.s32 32, %v1086_v17  ;;  %v1089_v58 = vshll.u32 %v2526_v33, %v1086_v17  ;;  %vm923_vm15 = vc.u32 %v3056_v36, %v3038_v4 }
 0x198   :  { %v1092_v47 = vshll.u32 %v2527_v37, %v1086_v17  ;;  %v1095_v10 = vshll.u32 %v2528_v39, %v1086_v17  ;;  %v925_v26 = vsel %vm923_vm15, %v924_v53, %v3039_v48  ;;  %v1098_v50 = vshll.u32 %v2529_v41, %v1086_v17 }
 0x199   :  { %v847_v46 = vxor.u32 2147483648, %v846_v0  ;;  %v1090_v56 = vshrl.u32 %v2527_v37, %v1087_v38  ;;  %v1093_v30 = vshrl.u32 %v2528_v39, %v1087_v38  ;;  %v926_v1 = vadd.s32 %v925_v26, %v921_v32 }
 0x19a   :  { %v1096_v6 = vshrl.u32 %v2529_v41, %v1087_v38  ;;  %v1099_v55 = vshrl.u32 %v2530_v43, %v1087_v38  ;;  %vm1104_vm1 = vcmp.lt.s32.totalorder %v3062_v8, 1  ;;  %v1101_v20 = vshll.u32 %v2530_v43, %v1086_v17 }
 0x19b   :  { %v848_v60 = vsel %vm765_vm0, %v847_v46, %v846_v0  ;;  %v1091_v61 = vor.u32 %v1090_v56, %v1089_v58  ;;  %v1094_v63 = vor.u32 %v1093_v30, %v1092_v47  ;;  %v927_v14 = vadd.s32 536870912, %v926_v1 }
 0x19c   :  { %v851_v52 = vsel %vm2998_vm12, %v2605_v12, %v848_v60  ;;  %v1097_v15 = vor.u32 %v1096_v6, %v1095_v10  ;;  %v1100_v35 = vor.u32 %v1099_v55, %v1098_v50  ;;  %v1102_v21 = vshrl.u32 %v2531_v51, %v1087_v38 }
 0x19d   :  { %2405 = vcosq.f32 %v851_v52  ;;  %vm1107_vm0 = vcmp.lt.s32.totalorder %v3062_v8, 4  ;;  %v3084_v57 = vshrl.u32 %v927_v14, 30  ;;  %vm1106_vm2 = vcmp.lt.s32.totalorder %v3062_v8, 3 }
 0x19e   :  { %2407 = vsinq.f32 %v851_v52  ;;  %v1112_v18 = vsel %vm1104_vm1, %v1091_v61, %v1094_v63  ;;  %v1113_v49 = vsel %vm1107_vm0, %v1100_v35, 920167782  ;;  %v1103_v28 = vor.u32 %v1102_v21, %v1101_v20 }
 0x19f   :  { %vm1105_vm3 = vcmp.lt.s32.totalorder %v3062_v8, 2  ;;  %v1114_v54 = vsel %vm1106_vm2, %v1097_v15, %v1113_v49  ;;  %v2176_v16 = vadd.s32 4294967169, %v973_v23  ;;  %v929_v11 = vshll.u32 %v3084_v57, 30 }
 0x1a0   :  { %v1115_v5 = vsel %vm1105_vm3, %v1112_v18, %v1114_v54  ;;  %v1116_v48 = vsel %vm1104_vm1, %v1094_v63, %v1097_v15  ;;  %v856_v22 = vand.u32 3, %v852_v44  ;;  %v1117_v24 = vsel %vm1107_vm0, %v1103_v28, 1326507024 }
 0x1a1   :  { %v3102_v31 = vmul.u32.u64.low %v3060_v19, %v1115_v5  ;;  %v3103_v9 = vmul.u32.u64.high %v3060_v19, %v1115_v5, %v3102_v31  ;;  %v3106_v29 = vsub.s32 %v926_v1, %v929_v11  ;;  %v1088_v27 = vshrl.u32 %v2526_v33, %v1087_v38 }
 0x1a2   :  { %v1109_v40 = vsel %vm1107_vm0, %v1097_v15, 2102212464  ;;  %v1118_v34 = vsel %vm1106_vm2, %v1100_v35, %v1117_v24  ;;  %v1692_v59 = vand.u32 3, %v1691_v45  ;;  %v979_v42 = vadd.s32 1, %v2176_v16 }
 0x1a3   :  { %v1119_v44 = vsel %vm1105_vm3, %v1116_v48, %v1118_v34  ;;  %vm855_vm4 = vweird.f32 %v2605_v12  ;;  %v932_v53 = vsub.s32 0, %v3106_v29  ;;  %v1108_v17 = vsel %vm1104_vm1, %v1088_v27, %v1091_v61 }
 0x1a4   :  { %v1110_v0 = vsel %vm1106_vm2, %v1094_v63, %v1109_v40  ;;  %v3122_v32 = vmul.u32.u64.low %v3060_v19, %v1119_v44  ;;  %v3123_v38 = vmul.u32.u64.high %v3060_v19, %v1119_v44, %v3122_v32  ;;  %vm980_vm5 = vcmp.gt.s32.totalorder %v979_v42, 0 }
 0x1a5   :  { %vm857_vm6 = vcmp.lt.s32.totalorder %v856_v22, 2  ;;  %vm858_vm7 = vcmp.eq.s32.totalorder %v856_v22, 0  ;;  %v2173_v58 = vmin.u32 %v932_v53, %v3106_v29  ;;  %v969_v23 = vand.u32 2147483647, %v2688_v3 }
 0x1a6   :  { %vm861_vm8 = vcmp.eq.s32.totalorder %v856_v22, 2  ;;  %vm1697_vm9 = vcmp.eq.s32.totalorder %v1692_v59, 2  ;;  %v981_v10 = vsel %vm980_vm5, %v979_v42, 0  ;;  %v1111_v30 = vsel %vm1105_vm3, %v1108_v17, %v1110_v0 }
 0x1a7   :  { %v2406_v45 = vpop.eup %2405  ;;  %v934_v56 = vclz %v2173_v58  ;;  %v1130_v50 = vadd.s32 1, %v3103_v9  ;;  %vm1694_vm10 = vcmp.eq.s32.totalorder %v1692_v59, 0  ;;  %v983_v6 = vand.u32 31, %v981_v10 }
 0x1a8   :  { %v2408_v46 = vpop.eup %2407  ;;  %v862_v47 = vxor.u32 2147483648, %v2406_v45  ;;  %vm1693_vm11 = vcmp.lt.s32.totalorder %v1692_v59, 2  ;;  %v1127_v15 = vmul.u32 %v3060_v19, %v1111_v30  ;;  %vm1129_vm12 = vc.u32 %v3123_v38, %v3102_v31 }
 0x1a9   :  { %v859_v26 = vxor.u32 2147483648, %v2408_v46  ;;  %v2174_v61 = vadd.s32 4294967294, %v934_v56  ;;  %v1131_v20 = vsel %vm1129_vm12, %v1130_v50, %v3103_v9  ;;  %v984_v49 = vsub.s32 32, %v983_v6 }
 0x1aa   :  { %v863_v60 = vsel %vm861_vm8, %v862_v47, %v2408_v46  ;;  %v1699_v1 = vsel %vm1697_vm9, %v862_v47, %v2408_v46  ;;  %v1132_v18 = vadd.s32 %v1131_v20, %v1127_v15  ;;  %v922_v19 = vadd.s32 %v3038_v4, %v3056_v36 }
 0x1ab   :  { %v860_v55 = vsel %vm858_vm7, %v2406_v45, %v859_v26  ;;  %v1696_v52 = vsel %vm1694_vm10, %v2406_v45, %v859_v26  ;;  %vm2175_vm13 = vcmp.lt.s32.totalorder %v2174_v61, 0  ;;  %v952_v11 = vsub.s32 4, %v3084_v57 }
 0x1ac   :  { %v864_v63 = vsel %vm857_vm6, %v860_v55, %v863_v60  ;;  %v1700_v14 = vsel %vm1693_vm11, %v1696_v52, %v1699_v1  ;;  %v937_v21 = vsel %vm2175_vm13, 0, %v2174_v61  ;;  %v1133_v5 = vadd.s32 536870912, %v1132_v18 }
 0x1ad   :  { %v865_v8 = vsel %vm855_vm4, nan, %v864_v63  ;;  %v1701_v35 = vsel %vm855_vm4, nan, %v1700_v14  ;;  %v938_v28 = vsub.s32 32, %v937_v21  ;;  %v942_v54 = vsub.s32 4294967266, %v937_v21 }
 0x1ae   :  { %1281 = vst [vmem:[#allocation7 + $0x18] sm:$0xff] %v865_v8  ;;  %2121 = vst [vmem:[#allocation8 + $0x18] sm:$0xff] %v1701_v35  ;;  %v939_v16 = vshll.u32 %v3106_v29, %v937_v21  ;;  %v976_v12 = vand.u32 8388607, %v969_v23  ;;  %v987_v24 = vshrl.u32 %v2527_v37, %v984_v49  ;;  %v990_v9 = vshrl.u32 %v2528_v39, %v984_v49 }
 0x1af   :  { %v940_v48 = vshrl.u32 %v922_v19, %v938_v28  ;;  %v943_v22 = vadd.s32 127, %v942_v54  ;;  %v3148_v27 = vshrl.u32 %v1133_v5, 30  ;;  %v986_v4 = vshll.u32 %v2526_v33, %v983_v6 }
 0x1b0   :  { %v989_v36 = vshll.u32 %v2527_v37, %v983_v6  ;;  %v993_v29 = vshrl.u32 %v2529_v41, %v984_v49  ;;  %v995_v59 = vshll.u32 %v2529_v41, %v983_v6  ;;  %v996_v44 = vshrl.u32 %v2530_v43, %v984_v49 }
 0x1b1   :  { %v941_v40 = vor.u32 %v940_v48, %v939_v16  ;;  %v944_v34 = vshll.u32 %v943_v22, 23  ;;  %vm868_vm14 = vcmp.lt.s32.totalorder %v2680_v62, 0  ;;  %v1135_v42 = vshll.u32 %v3148_v27, 30 }
 0x1b2   :  { %v982_v53 = vshrl.u32 %v981_v10, 5  ;;  %v992_v17 = vshll.u32 %v2528_v39, %v983_v6  ;;  %v988_v32 = vor.u32 %v987_v24, %v986_v4  ;;  %v991_v45 = vor.u32 %v990_v9, %v989_v36 }
 0x1b3   :  { %v945_v0 = vor.u32 4788187, %v944_v34  ;;  %v997_v58 = vor.u32 %v996_v44, %v995_v59  ;;  %vm3160_vm15 = vcmp.le.f32.partialorder %v866_v25, 0.7853982  ;;  %v953_v47 = vsel %vm868_vm14, %v952_v11, %v3084_v57 }
 0x1b4   :  { %v1136_v26 = vsub.s32 %v1132_v18, %v1135_v42  ;;  %v999_v56 = vshrl.u32 %v2531_v51, %v984_v49  ;;  %v948_v30 = vcvt.s32.f32 %v941_v40  ;;  %v977_v50 = vor.u32 8388608, %v976_v12 }
 0x1b5   :  { %v946_v10 = vand.u32 2147483647, %v945_v0  ;;  %v994_v60 = vor.u32 %v993_v29, %v992_v17  ;;  %v998_v55 = vshll.u32 %v2530_v43, %v983_v6  ;;  %vm1001_vm1 = vcmp.lt.s32.totalorder %v982_v53, 1 }
 0x1b6   :  { %v1138_v1 = vsub.s32 0, %v1136_v26  ;;  %vm1004_vm0 = vcmp.lt.s32.totalorder %v982_v53, 4  ;;  %v955_v52 = vsel %vm3160_vm15, 0, %v953_v47  ;;  %v1009_v61 = vsel %vm1001_vm1, %v988_v32, %v991_v45 }
 0x1b7   :  { %v949_v25 = vmul.f32 %v948_v30, %v946_v10  ;;  %v1010_v57 = vsel %vm1004_vm0, %v997_v58, 920167782  ;;  %v985_v14 = vshrl.u32 %v2526_v33, %v984_v49  ;;  %v1000_v15 = vor.u32 %v999_v56, %v998_v55 }
 0x1b8   :  { %v2181_v63 = vmin.u32 %v1138_v1, %v1136_v26  ;;  %vm1003_vm2 = vcmp.lt.s32.totalorder %v982_v53, 3  ;;  %vm1002_vm3 = vcmp.lt.s32.totalorder %v982_v53, 2  ;;  %v1006_v35 = vsel %vm1004_vm0, %v994_v60, 2102212464 }
 0x1b9   :  { %v950_v8 = vxor.u32 2147483648, %v949_v25  ;;  %v1011_v6 = vsel %vm1003_vm2, %v994_v60, %v1010_v57  ;;  %v1795_v20 = vadd.s32 3, %v955_v52  ;;  %v1005_v28 = vsel %vm1001_vm1, %v985_v14, %v988_v32 }
 0x1ba   :  { %v1140_v21 = vclz %v2181_v63  ;;  %v1012_v18 = vsel %vm1002_vm3, %v1009_v61, %v1011_v6  ;;  %v1013_v54 = vsel %vm1001_vm1, %v991_v45, %v994_v60  ;;  %v1017_v49 = vshll.u32 %v977_v50, 8 }
 0x1bb   :  { %v951_v19 = vsel %vm868_vm14, %v950_v8, %v949_v25  ;;  %v1007_v5 = vsel %vm1003_vm2, %v991_v45, %v1006_v35  ;;  %v1014_v12 = vsel %vm1004_vm0, %v1000_v15, 1326507024  ;;  %v1128_v9 = vadd.s32 %v3102_v31, %v3123_v38 }
 0x1bc   :  { %v954_v16 = vsel %vm3160_vm15, %v2680_v62, %v951_v19  ;;  %v2182_v11 = vadd.s32 4294967294, %v1140_v21  ;;  %v1015_v48 = vsel %vm1003_vm2, %v997_v58, %v1014_v12  ;;  %v1158_v29 = vsub.s32 4, %v3148_v27 }
 0x1bd   :  { %2409 = vcosq.f32 %v954_v16  ;;  %v3187_v22 = vmul.u32.u64.low %v1017_v49, %v1012_v18  ;;  %v3188_v24 = vmul.u32.u64.high %v1017_v49, %v1012_v18, %v3187_v22  ;;  %v1016_v4 = vsel %vm1002_vm3, %v1013_v54, %v1015_v48 }
 0x1be   :  { %2411 = vsinq.f32 %v954_v16  ;;  %vm2183_vm4 = vcmp.lt.s32.totalorder %v2182_v11, 0  ;;  %v3195_v40 = vmul.u32.u64.low %v1017_v49, %v1016_v4  ;;  %v3196_v34 = vmul.u32.u64.high %v1017_v49, %v1016_v4, %v3195_v40 }
 0x1bf   :  { %v1143_v36 = vsel %vm2183_vm4, 0, %v2182_v11  ;;  %v1008_v42 = vsel %vm1002_vm3, %v1005_v28, %v1007_v5  ;;  %v1178_v17 = vand.u32 2139095040, %v2695_v13  ;;  %v959_v0 = vand.u32 3, %v955_v52 }
 0x1c0   :  { %v1144_v59 = vsub.s32 32, %v1143_v36  ;;  %v1148_v44 = vsub.s32 4294967266, %v1143_v36  ;;  %vm1074_vm5 = vcmp.lt.s32.totalorder %v2686_v2, 0  ;;  %v1027_v31 = vadd.s32 1, %v3188_v24 }
 0x1c1   :  { %v1145_v38 = vshll.u32 %v1136_v26, %v1143_v36  ;;  %v1179_v58 = vshrl.u32 %v1178_v17, 23  ;;  %v1796_v46 = vand.u32 3, %v1795_v20  ;;  %v1159_v47 = vsel %vm1074_vm5, %v1158_v29, %v3148_v27 }
 0x1c2   :  { %v1146_v32 = vshrl.u32 %v1128_v9, %v1144_v59  ;;  %v1149_v45 = vadd.s32 127, %v1148_v44  ;;  %v1024_v56 = vmul.u32 %v1017_v49, %v1008_v42  ;;  %vm1026_vm6 = vc.u32 %v3196_v34, %v3187_v22 }
 0x1c3   :  { %v1028_v30 = vsel %vm1026_vm6, %v1027_v31, %v3188_v24  ;;  %v2184_v50 = vadd.s32 4294967169, %v1179_v58  ;;  %vm958_vm7 = vweird.f32 %v2680_v62  ;;  %vm960_vm8 = vcmp.lt.s32.totalorder %v959_v0, 2 }
 0x1c4   :  { %v1147_v53 = vor.u32 %v1146_v32, %v1145_v38  ;;  %v1150_v10 = vshll.u32 %v1149_v45, 23  ;;  %vm3211_vm9 = vcmp.le.f32.partialorder %v1072_v7, 0.7853982  ;;  %v1029_v60 = vadd.s32 %v1028_v30, %v1024_v56 }
 0x1c5   :  { %vm961_vm10 = vcmp.eq.s32.totalorder %v959_v0, 0  ;;  %vm964_vm11 = vcmp.eq.s32.totalorder %v959_v0, 2  ;;  %v1185_v1 = vadd.s32 1, %v2184_v50  ;;  %vm1797_vm12 = vcmp.lt.s32.totalorder %v1796_v46, 2 }
 0x1c6   :  { %v1151_v27 = vor.u32 4788187, %v1150_v10  ;;  %v1161_v25 = vsel %vm3211_vm9, 0, %v1159_v47  ;;  %v1030_v52 = vadd.s32 536870912, %v1029_v60  ;;  %v1175_v61 = vand.u32 2147483647, %v2695_v13 }
 0x1c7   :  { %v2410_v55 = vpop.eup %2409  ;;  %v1154_v7 = vcvt.s32.f32 %v1147_v53  ;;  %vm1186_vm13 = vcmp.gt.s32.totalorder %v1185_v1, 0  ;;  %vm1801_vm14 = vcmp.eq.s32.totalorder %v1796_v46, 2  ;;  %vm1798_vm15 = vcmp.eq.s32.totalorder %v1796_v46, 0 }
 0x1c8   :  { %v2412_v57 = vpop.eup %2411  ;;  %v965_v63 = vxor.u32 2147483648, %v2410_v55  ;;  %v1152_v14 = vand.u32 2147483647, %v1151_v27  ;;  %v3218_v8 = vshrl.u32 %v1030_v52, 30  ;;  %v1187_v35 = vsel %vm1186_vm13, %v1185_v1, 0 }
 0x1c9   :  { %v962_v15 = vxor.u32 2147483648, %v2412_v57  ;;  %v2003_v28 = vadd.s32 3, %v1161_v25  ;;  %v1189_v5 = vand.u32 31, %v1187_v35  ;;  %v1182_v4 = vand.u32 8388607, %v1175_v61 }
 0x1ca   :  { %v966_v6 = vsel %vm964_vm11, %v965_v63, %v2412_v57  ;;  %v1803_v20 = vsel %vm1801_vm14, %v965_v63, %v2412_v57  ;;  %v1155_v21 = vmul.f32 %v1154_v7, %v1152_v14  ;;  %v1032_v54 = vshll.u32 %v3218_v8, 30 }
 0x1cb   :  { %v963_v18 = vsel %vm961_vm10, %v2410_v55, %v962_v15  ;;  %v1800_v19 = vsel %vm1798_vm15, %v2410_v55, %v962_v15  ;;  %v1190_v36 = vsub.s32 32, %v1189_v5  ;;  %v3239_v62 = vand.u32 3, %v1161_v25 }
 0x1cc   :  { %v967_v49 = vsel %vm960_vm8, %v963_v18, %v966_v6  ;;  %v1804_v16 = vsel %vm1797_vm12, %v1800_v19, %v1803_v20  ;;  %v1156_v11 = vxor.u32 2147483648, %v1155_v21  ;;  %v3229_v24 = vsub.s32 %v1029_v60, %v1032_v54 }
 0x1cd   :  { %v968_v12 = vsel %vm958_vm7, nan, %v967_v49  ;;  %v1805_v48 = vsel %vm958_vm7, nan, %v1804_v16  ;;  %v3241_v59 = vand.u32 3, %v2003_v28  ;;  %v1193_v44 = vshrl.u32 %v2527_v37, %v1190_v36 }
 0x1ce   :  { %1282 = vst [vmem:[#allocation7 + $0x20] sm:$0xff] %v968_v12  ;;  %2122 = vst [vmem:[#allocation8 + $0x20] sm:$0xff] %v1805_v48  ;;  %v1157_v9 = vsel %vm1074_vm5, %v1156_v11, %v1155_v21  ;;  %v1035_v40 = vsub.s32 0, %v3229_v24  ;;  %v1183_v17 = vor.u32 8388608, %v1182_v4  ;;  %v1192_v0 = vshll.u32 %v2526_v33, %v1189_v5 }
 0x1cf   :  { %v1160_v29 = vsel %vm3211_vm9, %v2686_v2, %v1157_v9  ;;  %v1196_v31 = vshrl.u32 %v2528_v39, %v1190_v36  ;;  %v3247_v32 = vshrl.u32 %v1187_v35, 5  ;;  %v1195_v45 = vshll.u32 %v2527_v37, %v1189_v5 }
 0x1d0   :  { %2413 = vcosq.f32 %v1160_v29  ;;  %v2177_v42 = vmin.u32 %v1035_v40, %v3229_v24  ;;  %v1199_v58 = vshrl.u32 %v2529_v41, %v1190_v36  ;;  %vm1170_vm1 = vcmp.eq.s32.totalorder %v3239_v62, 2 }
 0x1d1   :  { %2415 = vsinq.f32 %v1160_v29  ;;  %vm2009_vm0 = vcmp.eq.s32.totalorder %v3241_v59, 2  ;;  %v1025_v46 = vadd.s32 %v3187_v22, %v3196_v34  ;;  %v1194_v47 = vor.u32 %v1193_v44, %v1192_v0 }
 0x1d2   :  { %v1037_v38 = vclz %v2177_v42  ;;  %v1198_v56 = vshll.u32 %v2528_v39, %v1189_v5  ;;  %vm1167_vm2 = vcmp.eq.s32.totalorder %v3239_v62, 0  ;;  %vm2006_vm3 = vcmp.eq.s32.totalorder %v3241_v59, 0 }
 0x1d3   :  { %v1197_v10 = vor.u32 %v1196_v31, %v1195_v45  ;;  %v1201_v37 = vshll.u32 %v2529_v41, %v1189_v5  ;;  %v1202_v30 = vshrl.u32 %v2530_v43, %v1190_v36  ;;  %vm1166_vm4 = vcmp.lt.s32.totalorder %v3239_v62, 2 }
 0x1d4   :  { %v2178_v53 = vadd.s32 4294967294, %v1037_v38  ;;  %vm2005_vm5 = vcmp.lt.s32.totalorder %v3241_v59, 2  ;;  %v1200_v50 = vor.u32 %v1199_v58, %v1198_v56  ;;  %v1204_v22 = vshll.u32 %v2530_v43, %v1189_v5 }
 0x1d5   :  { %v1205_v34 = vshrl.u32 %v2531_v51, %v1190_v36  ;;  %v3264_v39 = vshll.u32 %v1183_v17, 8  ;;  %vm1164_vm6 = vweird.f32 %v2686_v2  ;;  %v1191_v26 = vshrl.u32 %v2526_v33, %v1190_v36 }
 0x1d6   :  { %vm2179_vm7 = vcmp.lt.s32.totalorder %v2178_v53, 0  ;;  %v1203_v60 = vor.u32 %v1202_v30, %v1201_v37  ;;  %vm1207_vm8 = vcmp.lt.s32.totalorder %v3247_v32, 1  ;;  %vm1208_vm9 = vcmp.lt.s32.totalorder %v3247_v32, 2 }
 0x1d7   :  { %v1040_v41 = vsel %vm2179_vm7, 0, %v2178_v53  ;;  %v1206_v27 = vor.u32 %v1205_v34, %v1204_v22  ;;  %vm1209_vm10 = vcmp.lt.s32.totalorder %v3247_v32, 3  ;;  %vm1210_vm11 = vcmp.lt.s32.totalorder %v3247_v32, 4 }
 0x1d8   :  { %v1041_v1 = vsub.s32 32, %v1040_v41  ;;  %v1045_v43 = vsub.s32 4294967266, %v1040_v41  ;;  %v1215_v51 = vsel %vm1207_vm8, %v1194_v47, %v1197_v10  ;;  %v1042_v25 = vshll.u32 %v3229_v24, %v1040_v41 }
 0x1d9   :  { %v1216_v33 = vsel %vm1210_vm11, %v1203_v60, 920167782  ;;  %v1219_v52 = vsel %vm1207_vm8, %v1197_v10, %v1200_v50  ;;  %v1220_v57 = vsel %vm1210_vm11, %v1206_v27, 1326507024  ;;  %v1211_v20 = vsel %vm1207_vm8, %v1191_v26, %v1194_v47 }
 0x1da   :  { %v2414_v55 = vpop.eup %2413  ;;  %v1043_v7 = vshrl.u32 %v1025_v46, %v1041_v1  ;;  %v1046_v15 = vadd.s32 127, %v1045_v43  ;;  %v1217_v35 = vsel %vm1209_vm10, %v1200_v50, %v1216_v33  ;;  %v1212_v21 = vsel %vm1210_vm11, %v1200_v50, 2102212464 }
 0x1db   :  { %v2416_v63 = vpop.eup %2415  ;;  %v1171_v14 = vxor.u32 2147483648, %v2414_v55  ;;  %v1221_v18 = vsel %vm1209_vm10, %v1203_v60, %v1220_v57  ;;  %v1218_v5 = vsel %vm1208_vm9, %v1215_v51, %v1217_v35  ;;  %v1213_v4 = vsel %vm1209_vm10, %v1197_v10, %v1212_v21 }
 0x1dc   :  { %v1168_v6 = vxor.u32 2147483648, %v2416_v63  ;;  %v1044_v54 = vor.u32 %v1043_v7, %v1042_v25  ;;  %v1047_v49 = vshll.u32 %v1046_v15, 23  ;;  %v1222_v12 = vsel %vm1208_vm9, %v1219_v52, %v1221_v18 }
 0x1dd   :  { %v1172_v19 = vsel %vm1170_vm1, %v1171_v14, %v2416_v63  ;;  %v2011_v28 = vsel %vm2009_vm0, %v1171_v14, %v2416_v63  ;;  %v3306_v40 = vmul.u32.u64.low %v3264_v39, %v1222_v12  ;;  %v3307_v44 = vmul.u32.u64.high %v3264_v39, %v1222_v12, %v3306_v40 }
 0x1de   :  { %v1169_v16 = vsel %vm1167_vm2, %v2414_v55, %v1168_v6  ;;  %v2008_v11 = vsel %vm2006_vm3, %v2414_v55, %v1168_v6  ;;  %v1048_v9 = vor.u32 4788187, %v1047_v49  ;;  %v1051_v42 = vcvt.s32.f32 %v1044_v54 }
 0x1df   :  { %v1173_v48 = vsel %vm1166_vm4, %v1169_v16, %v1172_v19  ;;  %v2012_v24 = vsel %vm2005_vm5, %v2008_v11, %v2011_v28  ;;  %v3310_v59 = vmul.u32.u64.low %v3264_v39, %v1218_v5  ;;  %v3311_v17 = vmul.u32.u64.high %v3264_v39, %v1218_v5, %v3310_v59 }
 0x1e0   :  { %v1174_v36 = vsel %vm1164_vm6, nan, %v1173_v48  ;;  %v2013_v29 = vsel %vm1164_vm6, nan, %v2012_v24  ;;  %v1049_v62 = vand.u32 2147483647, %v1048_v9  ;;  %v1055_v31 = vsub.s32 4, %v3218_v8 }
 0x1e1   :  { %1284 = vst [vmem:[#allocation7 + $0x30] sm:$0xff] %v1174_v36  ;;  %2124 = vst [vmem:[#allocation8 + $0x30] sm:$0xff] %v2013_v29  ;;  %v1214_v38 = vsel %vm1208_vm9, %v1211_v20, %v1213_v4  ;;  %vm1232_vm12 = vc.u32 %v3307_v44, %v3310_v59  ;;  %v1233_v45 = vadd.s32 1, %v3311_v17  ;;  %vm971_vm13 = vcmp.lt.s32.totalorder %v2688_v3, 0 }
 0x1e2   :  { %v1052_v0 = vmul.f32 %v1051_v42, %v1049_v62  ;;  %v1230_v58 = vmul.u32 %v3264_v39, %v1214_v38  ;;  %vm970_vm14 = vcmp.le.f32.partialorder %v969_v23, 0.7853982  ;;  %v1056_v47 = vsel %vm971_vm13, %v1055_v31, %v3218_v8 }
 0x1e3   :  { %v1234_v56 = vsel %vm1232_vm12, %v1233_v45, %v3311_v17  ;;  %v1058_v10 = vsel %vm970_vm14, 0, %v1056_v47  ;;  %vm1061_vm5 = vweird.f32 %v2688_v3  ;;  %v1231_v35 = vadd.s32 %v3310_v59, %v3307_v44 }
 0x1e4   :  { %v1053_v2 = vxor.u32 2147483648, %v1052_v0  ;;  %v1235_v53 = vadd.s32 %v1234_v56, %v1230_v58  ;;  %v1899_v50 = vadd.s32 3, %v1058_v10  ;;  %v1062_v39 = vand.u32 3, %v1058_v10 }
 0x1e5   :  { %vm1177_vm7 = vcmp.lt.s32.totalorder %v2695_v13, 0  ;;  %vm1176_vm8 = vcmp.le.f32.partialorder %v1175_v61, 0.7853982 }
 0x1e6   :  { %v1054_v46 = vsel %vm971_vm13, %v1053_v2, %v1052_v0  ;;  %v1236_v37 = vadd.s32 536870912, %v1235_v53  ;;  %v1900_v26 = vand.u32 3, %v1899_v50  ;;  %vm1064_vm15 = vcmp.eq.s32.totalorder %v1062_v39, 0 }
 0x1e7   :  { %v1057_v32 = vsel %vm970_vm14, %v2688_v3, %v1054_v46  ;;  %vm1067_vm1 = vcmp.eq.s32.totalorder %v1062_v39, 2  ;;  %vm1063_vm3 = vcmp.lt.s32.totalorder %v1062_v39, 2 }
 0x1e8   :  { %2417 = vcosq.f32 %v1057_v32  ;;  %v1237_v30 = vshrl.u32 %v1236_v37, 30  ;;  %vm1905_vm0 = vcmp.eq.s32.totalorder %v1900_v26, 2  ;;  %vm1902_vm2 = vcmp.eq.s32.totalorder %v1900_v26, 0 }
 0x1e9   :  { %2419 = vsinq.f32 %v1057_v32  ;;  %vm1901_vm4 = vcmp.lt.s32.totalorder %v1900_v26, 2 }
 0x1ea   :  { %v1238_v22 = vshll.u32 %v1237_v30, 30  ;;  %v1261_v5 = vsub.s32 4, %v1237_v30 }
 0x1ec   :  { %v1239_v34 = vsub.s32 %v1235_v53, %v1238_v22  ;;  %v1262_v24 = vsel %vm1177_vm7, %v1261_v5, %v1237_v30 }
 0x1ed   :  { %v1264_v4 = vsel %vm1176_vm8, 0, %v1262_v24 }
 0x1ee   :  { %v1241_v60 = vsub.s32 0, %v1239_v34  ;;  %v2107_v36 = vadd.s32 3, %v1264_v4  ;;  %v1268_v29 = vand.u32 3, %v1264_v4 }
 0x1f0   :  { %v2185_v8 = vmin.u32 %v1241_v60, %v1239_v34  ;;  %v2108_v40 = vand.u32 3, %v2107_v36  ;;  %vm1273_vm9 = vcmp.eq.s32.totalorder %v1268_v29, 2  ;;  %vm1270_vm11 = vcmp.eq.s32.totalorder %v1268_v29, 0 }
 0x1f1   :  { %vm1269_vm13 = vcmp.lt.s32.totalorder %v1268_v29, 2 }
 0x1f2   :  { %v2418_v23 = vpop.eup %2417  ;;  %v1243_v55 = vclz %v2185_v8  ;;  %vm2113_vm10 = vcmp.eq.s32.totalorder %v2108_v40, 2  ;;  %vm2110_vm12 = vcmp.eq.s32.totalorder %v2108_v40, 0  ;;  %vm2109_vm14 = vcmp.lt.s32.totalorder %v2108_v40, 2 }
 0x1f3   :  { %v2420_v41 = vpop.eup %2419  ;;  %v1068_v27 = vxor.u32 2147483648, %v2418_v23 }
 0x1f4   :  { %v1065_v1 = vxor.u32 2147483648, %v2420_v41  ;;  %v2186_v63 = vadd.s32 4294967294, %v1243_v55 }
 0x1f5   :  { %v1069_v43 = vsel %vm1067_vm1, %v1068_v27, %v2420_v41  ;;  %v1907_v51 = vsel %vm1905_vm0, %v1068_v27, %v2420_v41 }
 0x1f6   :  { %v1066_v25 = vsel %vm1064_vm15, %v2418_v23, %v1065_v1  ;;  %v1904_v33 = vsel %vm1902_vm2, %v2418_v23, %v1065_v1  ;;  %vm2187_vm6 = vcmp.lt.s32.totalorder %v2186_v63, 0  ;;  %vm1267_vm15 = vweird.f32 %v2695_v13 }
 0x1f7   :  { %v1070_v52 = vsel %vm1063_vm3, %v1066_v25, %v1069_v43  ;;  %v1908_v57 = vsel %vm1901_vm4, %v1904_v33, %v1907_v51  ;;  %v1246_v15 = vsel %vm2187_vm6, 0, %v2186_v63 }
 0x1f8   :  { %v1071_v14 = vsel %vm1061_vm5, nan, %v1070_v52  ;;  %v1909_v7 = vsel %vm1061_vm5, nan, %v1908_v57  ;;  %v1247_v6 = vsub.s32 32, %v1246_v15  ;;  %v1251_v20 = vsub.s32 4294967266, %v1246_v15 }
 0x1f9   :  { %1283 = vst [vmem:[#allocation7 + $0x28] sm:$0xff] %v1071_v14  ;;  %2123 = vst [vmem:[#allocation8 + $0x28] sm:$0xff] %v1909_v7  ;;  %v1248_v21 = vshll.u32 %v1239_v34, %v1246_v15 }
 0x1fa   :  { %v1249_v18 = vshrl.u32 %v1231_v35, %v1247_v6  ;;  %v1252_v19 = vadd.s32 127, %v1251_v20 }
 0x1fc   :  { %v1250_v28 = vor.u32 %v1249_v18, %v1248_v21  ;;  %v1253_v54 = vshll.u32 %v1252_v19, 23 }
 0x1fe   :  { %v1254_v49 = vor.u32 4788187, %v1253_v54  ;;  %v1257_v16 = vcvt.s32.f32 %v1250_v28 }
 0x200   :  { %v1255_v3 = vand.u32 2147483647, %v1254_v49 }
 0x202   :  { %v1258_v11 = vmul.f32 %v1257_v16, %v1255_v3 }
 0x204   :  { %v1259_v12 = vxor.u32 2147483648, %v1258_v11 }
 0x206   :  { %v1260_v48 = vsel %vm1177_vm7, %v1259_v12, %v1258_v11 }
 0x207   :  { %v1263_v9 = vsel %vm1176_vm8, %v2695_v13, %v1260_v48 }
 0x208   :  { %2421 = vcosq.f32 %v1263_v9 }
 0x209   :  { %2423 = vsinq.f32 %v1263_v9 }
 0x212   :  { %v2422_v44 = vpop.eup %2421 }
 0x213   :  { %v2424_v62 = vpop.eup %2423  ;;  %v1274_v42 = vxor.u32 2147483648, %v2422_v44 }
 0x214   :  { %v1271_v59 = vxor.u32 2147483648, %v2424_v62 }
 0x215   :  { %v1275_v61 = vsel %vm1273_vm9, %v1274_v42, %v2424_v62  ;;  %v2115_v17 = vsel %vm2113_vm10, %v1274_v42, %v2424_v62 }
 0x216   :  { %v1272_v0 = vsel %vm1270_vm11, %v2422_v44, %v1271_v59  ;;  %v2112_v31 = vsel %vm2110_vm12, %v2422_v44, %v1271_v59 }
 0x217   :  { %v1276_v38 = vsel %vm1269_vm13, %v1272_v0, %v1275_v61  ;;  %v2116_v2 = vsel %vm2109_vm14, %v2112_v31, %v2115_v17 }
 0x218   :  { %v1277_v45 = vsel %vm1267_vm15, nan, %v1276_v38  ;;  %v2117_v58 = vsel %vm1267_vm15, nan, %v2116_v2 }
 0x219   :  { %1285 = vst [vmem:[#allocation7 + $0x38] sm:$0xff] %v1277_v45  ;;  %2125 = vst [vmem:[#allocation8 + $0x38] sm:$0xff] %v2117_v58 }
 0x21a   :  { %2480 = shalt.err (!%p2477_p6)
}
 0x21b   :  { %s2481_s16 = scalar_lea.hbm %s3358_s2, 1024 }
 0x21c   :  { %p2482_p7 = scmp.ne.s32.totalorder %s3358_s2, %s2481_s16  ;;  %p2485_p8 = scmp.lt.u32.totalorder %s2481_s16, %s3358_s2 }
 0x21e   :  { %p2487_p9 = pnand %p2485_p8, %p2482_p7 }
 0x220   :  { %2490 = shalt.err (!%p2487_p9)
}
 0x221   :  { %2135 = dma.vmem_to_hbm [thread:$0]  %s2133_s10, 1024, %s3358_s2, [#allocation4]  }
 0x222   :  { %s2491_s23 = scalar_lea.vmem %s2143_s12, 1024  ;;  %p2496_p11 = scmp.lt.s32.totalorder %s2143_s12, %s2143_s12 }
 0x223   :  { %p2492_p10 = scmp.ne.s32.totalorder %s2143_s12, %s2491_s23  ;;  %p2497_p12 = scmp.lt.s32.totalorder %s2491_s23, %s2491_s23 }
 0x225   :  { %p2498_p13 = por %p2497_p12, %p2496_p11 }
 0x227   :  { %p2499_p0 = pnand %p2498_p13, %p2492_p10 }
 0x229   :  { %2502 = shalt.err (!%p2499_p0)
}
 0x22a   :  { %s2503_s26 = scalar_lea.hbm %s3359_s3, 1024 }
 0x22b   :  { %p2504_p1 = scmp.ne.s32.totalorder %s3359_s3, %s2503_s26  ;;  %p2507_p2 = scmp.lt.u32.totalorder %s2503_s26, %s3359_s3 }
 0x22d   :  { %p2509_p3 = pnand %p2507_p2, %p2504_p1 }
 0x22f   :  { %2512 = shalt.err (!%p2509_p3)
}
 0x230   :  { %2145 = dma.vmem_to_hbm [thread:$0]  %s2143_s12, 1024, %s3359_s3, [#allocation9]  }
 0x231   :  { %2517 = dma.done.wait [#allocation4], 1024  }
 0x232   :  { %2518 = vsyncadd [#allocation4], 4294966272 }
 0x233   :  { %2519 = dma.done.wait [#allocation9], 1024  }
 0x234   :  { %2520 = vsyncadd [#allocation9], 4294966272 }
 0x235   :  { %2152 = vsyncpa [#allocation3], 1 }
 0x236   :  { %2153 = vsyncpa [#allocation6], 1 }
 0x237   :  { %2154 = vsyncpa [#allocation4], 1 }
 0x238   :  { %2155 = vsyncpa [#allocation9], 1 }

</bundles_post_ra>
